<compile_context>
chip_gen: v7x
topology: tpu7x:2x2x1
jax: 0.10.0
libtpu: 0.0.40
codegen_flags: <defaults>
</compile_context>

<pallas_src>
import functools

import jax
import jax.numpy as jnp
from jax import lax
from jax.experimental import pallas as pl
from jax.experimental.pallas import tpu as pltpu


# ----------------------------------------------------------------------------
# Fused bottleneck kernel (one grid step == one image)
# ----------------------------------------------------------------------------
def _bottleneck_kernel(H, W, OFF, x_ref, w1_ref, w2_ref, w3_ref,
                       s1_ref, b1_ref, s2_ref, b2_ref, s3_ref, b3_ref,
                       out_ref, pad_ref):
    HW = H * W
    width = w1_ref.shape[1]
    K = 3 * width

    x = x_ref[0]                                    # (HW, Cp)  f32

    # --- conv1 (1x1) + bn1 + relu -------------------------------------------
    a1 = jnp.dot(x.astype(jnp.bfloat16), w1_ref[...],
                 preferred_element_type=jnp.float32)
    a1 = jnp.maximum(a1 * s1_ref[...] + b1_ref[...], 0.0)
    a1_bf = a1.astype(jnp.bfloat16)

    # --- stage conv1 output for the K-fused 3x3 conv --------------------------
    # Zero only the two border strips (vertical padding); the interior of every
    # channel block is fully overwritten by the a1 stores below.  NOT gated on
    # program_id: each core (megacore split) owns its own scratch.
    zeros_strip = jnp.zeros((2 * W, K), jnp.bfloat16)
    pad_ref[OFF - W:OFF + W, :] = zeros_strip
    pad_ref[OFF + HW - W:OFF + HW + W, :] = zeros_strip

    # Three kh-shifted copies of a1, one per channel block of the K axis.
    # Block j holds a1 shifted so that a row slice at OFF+dw reads the tap for
    # kernel row kh=j (dh = j-1) and kernel col kw=dw+1.
    pad_ref[OFF + W:OFF + W + HW, 0:width] = a1_bf              # kh = 0 (dh=-1)
    pad_ref[OFF:OFF + HW, width:2 * width] = a1_bf              # kh = 1 (dh= 0)
    pad_ref[OFF - W:OFF - W + HW, 2 * width:3 * width] = a1_bf  # kh = 2 (dh=+1)

    # --- conv2 (3x3, pad=1, stride=1) + bn2 + relu ----------------------------
    # Horizontal-edge masks (same for all three kh blocks), boolean selects.
    col = lax.broadcasted_iota(jnp.int32, (HW, K), 0) % W
    not_left = col != 0
    not_right = col != (W - 1)

    acc2 = jnp.zeros((HW, width), jnp.float32)
    for dw in (-1, 0, 1):                           # 3 K-fused MXU matmuls
        tap = pad_ref[OFF + dw:OFF + dw + HW, :]    # (HW, 3*width) bf16
        if dw == -1:
            tap = jnp.where(not_left, tap, jnp.bfloat16(0))
        elif dw == 1:
            tap = jnp.where(not_right, tap, jnp.bfloat16(0))
        acc2 = acc2 + jnp.dot(tap, w2_ref[dw + 1],
                              preferred_element_type=jnp.float32)
    a2 = jnp.maximum(acc2 * s2_ref[...] + b2_ref[...], 0.0)

    # --- conv3 (1x1, ib2 folded into w3) + bn3 + residual + relu --------------
    a3 = jnp.dot(a2.astype(jnp.bfloat16), w3_ref[...],
                 preferred_element_type=jnp.float32)
    a3 = a3 * s3_ref[...] + b3_ref[...]
    out_ref[0] = jnp.maximum(a3 + x, 0.0)           # exact f32 residual add


# ----------------------------------------------------------------------------
# Glue (plain JAX): layout transposes, BN folding, lane padding, parameter prep
# ----------------------------------------------------------------------------
def fold_bn(gamma, beta, mean, var, eps=1e-5):
    scale = gamma / jnp.sqrt(var + eps)
    bias = beta - mean * scale
    return scale[None, :], bias[None, :]


def _round_up(v, m):
    return ((v + m - 1) // m) * m


def _vmem_limit_bytes():
    cap = None
    try:
        info = pltpu.get_tpu_info()
        cap = getattr(info, "vmem_capacity_bytes", None)
    except Exception:
        cap = None
    if not cap:
        cap = 128 * 1024 * 1024
    # 48 MiB on 128 MiB parts (v5e/v6e); ~60% of physical on smaller (v7x: ~38 MiB).
    return int(min(48 * 1024 * 1024, cap * 3 // 5))


def bottleneck_forward(x_nchw, p):
    """Bottleneck.forward with stride=1, downsample=None, wib=0, eval-mode BN."""
    N, Cin, H, W = x_nchw.shape
    width = p["w1"].shape[0]
    Cout = p["w3"].shape[0]
    assert Cin == Cout, "downsample is None => inplanes must equal planes*expansion"
    HW = H * W

    # Lane-dense channel count for the output store / MXU N-fill.
    Cp = _round_up(Cout, 128)

    # NCHW -> (N, H*W, C) with channels on the lane axis (zero-pad to Cp).
    x2d = jnp.transpose(x_nchw, (0, 2, 3, 1)).reshape(N, HW, Cin)
    if Cp != Cin:
        x2d = jnp.pad(x2d, ((0, 0), (0, 0), (0, Cp - Cin)))

    # conv1 weight as (Cp, width), bf16 (padded input-channel rows are zero).
    w1 = p["w1"].reshape(width, Cin).T
    if Cp != Cin:
        w1 = jnp.pad(w1, ((0, Cp - Cin), (0, 0)))
    w1 = w1.astype(jnp.bfloat16)

    # conv2 weight fused over kh into the contraction axis: (kw, kh*width+ci, co).
    w2 = jnp.transpose(p["w2"], (3, 2, 1, 0)).reshape(3, 3 * width, width)
    w2 = w2.astype(jnp.bfloat16)

    # conv3 weight with ib2 (eval-mode gate) folded into the input-channel rows,
    # output channels zero-padded to Cp.
    w3 = p["ib2"][:, None] * p["w3"].reshape(Cout, width).T     # (width, Cout)
    if Cp != Cout:
        w3 = jnp.pad(w3, ((0, 0), (0, Cp - Cout)))
    w3 = w3.astype(jnp.bfloat16)

    s1, b1 = fold_bn(*p["bn1"])
    s2, b2 = fold_bn(*p["bn2"])
    s3, b3 = fold_bn(*p["bn3"])
    if Cp != Cout:
        s3 = jnp.pad(s3, ((0, 0), (0, Cp - Cout)))
        b3 = jnp.pad(b3, ((0, 0), (0, Cp - Cout)))

    # Flat padded scratch layout: block-1 rows live at [OFF, OFF+HW); the kh=0/2
    # copies at [OFF+W, .) / [OFF-W, .); zero borders of 2*W rows at each end.
    OFF = _round_up(W, 16)
    R = _round_up(OFF + HW + W, 16)

    kernel = functools.partial(_bottleneck_kernel, H, W, OFF)

    flops = 2 * N * HW * (Cp * width + 9 * width * width + width * Cp)
    bytes_accessed = (N * HW * Cp * 4 * 2
                      + (w1.size + w2.size + w3.size) * 2
                      + (s1.size + b1.size + s2.size + b2.size + s3.size + b3.size) * 4)

    out2d = pl.pallas_call(
        kernel,
        out_shape=jax.ShapeDtypeStruct((N, HW, Cp), jnp.float32),
        grid_spec=pltpu.PrefetchScalarGridSpec(
            num_scalar_prefetch=0,
            grid=(N,),
            in_specs=[
                pl.BlockSpec((1, HW, Cp), lambda n: (n, 0, 0)),           # x (per image)
                pl.BlockSpec((Cp, width), lambda n: (0, 0)),              # w1
                pl.BlockSpec((3, 3 * width, width), lambda n: (0, 0, 0)),  # w2 (K-fused)
                pl.BlockSpec((width, Cp), lambda n: (0, 0)),              # w3 (ib2 folded)
                pl.BlockSpec((1, width), lambda n: (0, 0)),               # bn1 scale
                pl.BlockSpec((1, width), lambda n: (0, 0)),               # bn1 bias
                pl.BlockSpec((1, width), lambda n: (0, 0)),               # bn2 scale
                pl.BlockSpec((1, width), lambda n: (0, 0)),               # bn2 bias
                pl.BlockSpec((1, Cp), lambda n: (0, 0)),                  # bn3 scale
                pl.BlockSpec((1, Cp), lambda n: (0, 0)),                  # bn3 bias
            ],
            out_specs=pl.BlockSpec((1, HW, Cp), lambda n: (n, 0, 0)),
            scratch_shapes=[pltpu.VMEM((R, 3 * width), jnp.bfloat16)],
        ),
        compiler_params=pltpu.CompilerParams(
            dimension_semantics=("parallel",),
            vmem_limit_bytes=_vmem_limit_bytes(),
        ),
        cost_estimate=pl.CostEstimate(
            flops=flops, transcendentals=0, bytes_accessed=bytes_accessed),
    )(x2d, w1, w2, w3, s1, b1, s2, b2, s3, b3)

    out2d = out2d[:, :, :Cout]
    return jnp.transpose(out2d.reshape(N, H, W, Cout), (0, 3, 1, 2))  # back to NCHW


# ----------------------------------------------------------------------------
# Pure-JAX f32 reference (faithful to the PyTorch module, for correctness)
# ----------------------------------------------------------------------------
def reference_forward(x, p):
    def bn(y, gamma, beta, mean, var, eps=1e-5):
        sh = (1, -1, 1, 1)
        return (gamma.reshape(sh) * (y - mean.reshape(sh))
                / jnp.sqrt(var.reshape(sh) + eps) + beta.reshape(sh))

    dn = ("NCHW", "OIHW", "NCHW")
    out = lax.conv_general_dilated(x, p["w1"], (1, 1), "VALID", dimension_numbers=dn)
    out = jax.nn.relu(bn(out, *p["bn1"]))
    out = lax.conv_general_dilated(out, p["w2"], (1, 1), ((1, 1), (1, 1)),
                                   dimension_numbers=dn)
    out = jax.nn.relu(bn(out, *p["bn2"]))
    out = out * p["ib2"].reshape(1, -1, 1, 1)
    out = lax.conv_general_dilated(out, p["w3"], (1, 1), "VALID", dimension_numbers=dn)
    out = bn(out, *p["bn3"]) + x
    return jax.nn.relu(out)


# ----------------------------------------------------------------------------
# Deterministic parameter init + run
# ----------------------------------------------------------------------------
def make_params(key, inplanes, planes, base_width=64, groups=1, expansion=4):
    width = int(planes * (base_width / 64.0)) * groups
    cout = planes * expansion
    ks = jax.random.split(key, 16)

    def bn_params(k, c):
        k1, k2, k3, k4 = jax.random.split(k, 4)
        gamma = 1.0 + 0.1 * jax.random.normal(k1, (c,), jnp.float32)
        beta = 0.1 * jax.random.normal(k2, (c,), jnp.float32)
        mean = 0.1 * jax.random.normal(k3, (c,), jnp.float32)
        var = 1.0 + 0.1 * jnp.abs(jax.random.normal(k4, (c,), jnp.float32))
        return (gamma, beta, mean, var)

    return {
        "w1": 0.1 * jax.random.normal(ks[0], (width, inplanes, 1, 1), jnp.float32),
        "w2": 0.1 * jax.random.normal(ks[1], (width, width, 3, 3), jnp.float32),
        "w3": 0.1 * jax.random.normal(ks[2], (cout, width, 1, 1), jnp.float32),
        "bn1": bn_params(ks[3], width),
        "bn2": bn_params(ks[4], width),
        "bn3": bn_params(ks[5], cout),
        "ib2": 1.0 + 0.1 * jax.random.normal(ks[6], (width,), jnp.float32),
    }


if __name__ == "__main__":
    key = jax.random.PRNGKey(0)
    k_x, k_p = jax.random.split(key)

    inplanes, planes = 16, 4          # width = 4, output channels = 16 (= inplanes)
    N, H, W = 2, 16, 16
    x = jax.random.normal(k_x, (N, inplanes, H, W), jnp.float32)
    params = make_params(k_p, inplanes, planes)

    out = jax.jit(bottleneck_forward)(x, params)
    out = jax.block_until_ready(out)

    ref = reference_forward(x, params)
    assert out.shape == ref.shape == (N, planes * 4, H, W)
    # bf16 MXU inputs with f32 accumulation vs an all-f32 reference.
    assert jnp.allclose(out, ref, rtol=3e-2, atol=3e-2), (
        float(jnp.max(jnp.abs(out - ref))))

    print("KERNEL_OK")
</pallas_src>

<mosaic_0001>
module attributes {stable_mosaic.version = 11 : i64} {
  func.func @_bottleneck_kernel(%arg0: i32, %arg1: memref<1x256x128xf32, #tpu.memory_space<vmem>>, %arg2: memref<128x4xbf16, #tpu.memory_space<vmem>>, %arg3: memref<3x12x4xbf16, #tpu.memory_space<vmem>>, %arg4: memref<4x128xbf16, #tpu.memory_space<vmem>>, %arg5: memref<1x4xf32, #tpu.memory_space<vmem>>, %arg6: memref<1x4xf32, #tpu.memory_space<vmem>>, %arg7: memref<1x4xf32, #tpu.memory_space<vmem>>, %arg8: memref<1x4xf32, #tpu.memory_space<vmem>>, %arg9: memref<1x128xf32, #tpu.memory_space<vmem>>, %arg10: memref<1x128xf32, #tpu.memory_space<vmem>>, %arg11: memref<1x256x128xf32, #tpu.memory_space<vmem>>, %arg12: memref<288x12xbf16, #tpu.memory_space<vmem>>) attributes {dimension_semantics = [#tpu.dimension_semantics<parallel>], iteration_bounds = array<i64: 2>, scalar_prefetch = 0 : i64, scratch_operands = 1 : i64, tpu.core_type = #tpu.core_type<tc>, window_params = [{transform_indices = @transform_0, window_bounds = array<i64: 1, 256, 128>}, {pipeline_mode = #tpu.pipeline_mode<synchronous>, transform_indices = @transform_1, window_bounds = array<i64: 128, 4>}, {pipeline_mode = #tpu.pipeline_mode<synchronous>, transform_indices = @transform_2, window_bounds = array<i64: 3, 12, 4>}, {pipeline_mode = #tpu.pipeline_mode<synchronous>, transform_indices = @transform_3, window_bounds = array<i64: 4, 128>}, {pipeline_mode = #tpu.pipeline_mode<synchronous>, transform_indices = @transform_4, window_bounds = array<i64: 1, 4>}, {pipeline_mode = #tpu.pipeline_mode<synchronous>, transform_indices = @transform_5, window_bounds = array<i64: 1, 4>}, {pipeline_mode = #tpu.pipeline_mode<synchronous>, transform_indices = @transform_6, window_bounds = array<i64: 1, 4>}, {pipeline_mode = #tpu.pipeline_mode<synchronous>, transform_indices = @transform_7, window_bounds = array<i64: 1, 4>}, {pipeline_mode = #tpu.pipeline_mode<synchronous>, transform_indices = @transform_8, window_bounds = array<i64: 1, 128>}, {pipeline_mode = #tpu.pipeline_mode<synchronous>, transform_indices = @transform_9, window_bounds = array<i64: 1, 128>}, {transform_indices = @transform_10, window_bounds = array<i64: 1, 256, 128>}]} {
    %c0 = arith.constant 0 : index
    %c0_0 = arith.constant 0 : index
    %c0_1 = arith.constant 0 : index
    %0 = vector.load %arg1[%c0, %c0_0, %c0_1] : memref<1x256x128xf32, #tpu.memory_space<vmem>>, vector<1x256x128xf32>
    %1 = vector.shape_cast %0 : vector<1x256x128xf32> to vector<256x128xf32>
    %2 = arith.truncf %1 : vector<256x128xf32> to vector<256x128xbf16>
    %c0_2 = arith.constant 0 : index
    %c0_3 = arith.constant 0 : index
    %3 = vector.load %arg2[%c0_2, %c0_3] : memref<128x4xbf16, #tpu.memory_space<vmem>>, vector<128x4xbf16>
    %cst = arith.constant dense<0.000000e+00> : vector<256x4xf32>
    %4 = tpu.matmul %2, %3, %cst {dimension_numbers = #tpu.dot_dimension_numbers<[1], [0], [0], [1], [0, 0, 1, 1], [], []>} : vector<256x128xbf16>, vector<128x4xbf16>, vector<256x4xf32> -> vector<256x4xf32>
    %c0_4 = arith.constant 0 : index
    %c0_5 = arith.constant 0 : index
    %5 = vector.load %arg5[%c0_4, %c0_5] : memref<1x4xf32, #tpu.memory_space<vmem>>, vector<1x4xf32>
    %6 = vector.broadcast %5 : vector<1x4xf32> to vector<256x4xf32>
    %7 = arith.mulf %4, %6 : vector<256x4xf32>
    %c0_6 = arith.constant 0 : index
    %c0_7 = arith.constant 0 : index
    %8 = vector.load %arg6[%c0_6, %c0_7] : memref<1x4xf32, #tpu.memory_space<vmem>>, vector<1x4xf32>
    %9 = vector.broadcast %8 : vector<1x4xf32> to vector<256x4xf32>
    %10 = arith.addf %7, %9 : vector<256x4xf32>
    %cst_8 = arith.constant 0.000000e+00 : f32
    %11 = vector.broadcast %cst_8 : f32 to vector<256x4xf32>
    %12 = arith.maximumf %10, %11 : vector<256x4xf32>
    %13 = arith.truncf %12 : vector<256x4xf32> to vector<256x4xbf16>
    %cst_9 = arith.constant 0.000000e+00 : bf16
    %14 = vector.broadcast %cst_9 : bf16 to vector<32x12xbf16>
    %c0_10 = arith.constant 0 : index
    %c0_11 = arith.constant 0 : index
    %15 = vector.load %arg12[%c0_10, %c0_11] : memref<288x12xbf16, #tpu.memory_space<vmem>>, vector<32x12xbf16>
    tpu.vector_store %arg12[%c0_10, %c0_11], %14 {strides = array<i32>} : memref<288x12xbf16, #tpu.memory_space<vmem>>, vector<32x12xbf16>,
    %c256 = arith.constant 256 : index
    %c0_12 = arith.constant 0 : index
    %16 = vector.load %arg12[%c256, %c0_12] : memref<288x12xbf16, #tpu.memory_space<vmem>>, vector<32x12xbf16>
    tpu.vector_store %arg12[%c256, %c0_12], %14 {strides = array<i32>} : memref<288x12xbf16, #tpu.memory_space<vmem>>, vector<32x12xbf16>,
    %c32 = arith.constant 32 : index
    %c0_13 = arith.constant 0 : index
    %17 = vector.load %arg12[%c32, %c0_13] : memref<288x12xbf16, #tpu.memory_space<vmem>>, vector<256x4xbf16>
    tpu.vector_store %arg12[%c32, %c0_13], %13 {strides = array<i32>} : memref<288x12xbf16, #tpu.memory_space<vmem>>, vector<256x4xbf16>,
    %c16 = arith.constant 16 : index
    %c4 = arith.constant 4 : index
    %18 = vector.load %arg12[%c16, %c4] : memref<288x12xbf16, #tpu.memory_space<vmem>>, vector<256x4xbf16>
    tpu.vector_store %arg12[%c16, %c4], %13 {strides = array<i32>} : memref<288x12xbf16, #tpu.memory_space<vmem>>, vector<256x4xbf16>,
    %c0_14 = arith.constant 0 : index
    %c8 = arith.constant 8 : index
    %19 = vector.load %arg12[%c0_14, %c8] : memref<288x12xbf16, #tpu.memory_space<vmem>>, vector<256x4xbf16>
    tpu.vector_store %arg12[%c0_14, %c8], %13 {strides = array<i32>} : memref<288x12xbf16, #tpu.memory_space<vmem>>, vector<256x4xbf16>,
    %20 = tpu.iota {dimensions = array<i32: 0>} : vector<256x12xi32>
    %c16_i32 = arith.constant 16 : i32
    %c0_i32 = arith.constant 0 : i32
    %21 = arith.cmpi eq, %c16_i32, %c0_i32 : i32
    %c1_i32 = arith.constant 1 : i32
    %22 = arith.select %21, %c1_i32, %c16_i32 : i32
    %23 = vector.broadcast %22 : i32 to vector<256x12xi32>
    %24 = arith.remsi %20, %23 : vector<256x12xi32>
    %c0_i32_15 = arith.constant 0 : i32
    %25 = vector.broadcast %c0_i32_15 : i32 to vector<256x12xi32>
    %26 = arith.cmpi ne, %24, %25 : vector<256x12xi32>
    %c0_i32_16 = arith.constant 0 : i32
    %27 = vector.broadcast %c0_i32_16 : i32 to vector<256x12xi32>
    %28 = arith.cmpi slt, %24, %27 : vector<256x12xi32>
    %c0_i32_17 = arith.constant 0 : i32
    %29 = arith.cmpi slt, %22, %c0_i32_17 : i32
    %30 = vector.broadcast %29 : i1 to vector<256x12xi1>
    %31 = vector.broadcast %30 : vector<256x12xi1> to vector<256x12xi1>
    %32 = arith.xori %28, %31 : vector<256x12xi1>
    %33 = arith.andi %32, %26 : vector<256x12xi1>
    %34 = vector.broadcast %22 : i32 to vector<256x12xi32>
    %35 = arith.addi %24, %34 : vector<256x12xi32>
    %36 = arith.select %33, %35, %24 : vector<256x12xi1>, vector<256x12xi32>
    %c0_i32_18 = arith.constant 0 : i32
    %37 = vector.broadcast %c0_i32_18 : i32 to vector<256x12xi32>
    %38 = arith.cmpi ne, %36, %37 : vector<256x12xi32>
    %c15_i32 = arith.constant 15 : i32
    %39 = vector.broadcast %c15_i32 : i32 to vector<256x12xi32>
    %40 = arith.cmpi ne, %36, %39 : vector<256x12xi32>
    %cst_19 = arith.constant 0.000000e+00 : f32
    %41 = vector.broadcast %cst_19 : f32 to vector<256x4xf32>
    %c15 = arith.constant 15 : index
    %c0_20 = arith.constant 0 : index
    %42 = vector.load %arg12[%c15, %c0_20] : memref<288x12xbf16, #tpu.memory_space<vmem>>, vector<256x12xbf16>
    %cst_21 = arith.constant 0.000000e+00 : bf16
    %43 = vector.broadcast %cst_21 : bf16 to vector<256x12xbf16>
    %44 = arith.select %38, %42, %43 : vector<256x12xi1>, vector<256x12xbf16>
    %c0_22 = arith.constant 0 : index
    %c0_23 = arith.constant 0 : index
    %c0_24 = arith.constant 0 : index
    %45 = vector.load %arg3[%c0_22, %c0_23, %c0_24] : memref<3x12x4xbf16, #tpu.memory_space<vmem>>, vector<1x12x4xbf16>
    %46 = vector.shape_cast %45 : vector<1x12x4xbf16> to vector<12x4xbf16>
    %cst_25 = arith.constant dense<0.000000e+00> : vector<256x4xf32>
    %47 = tpu.matmul %44, %46, %cst_25 {dimension_numbers = #tpu.dot_dimension_numbers<[1], [0], [0], [1], [0, 0, 1, 1], [], []>} : vector<256x12xbf16>, vector<12x4xbf16>, vector<256x4xf32> -> vector<256x4xf32>
    %48 = arith.addf %41, %47 : vector<256x4xf32>
    %c16_26 = arith.constant 16 : index
    %c0_27 = arith.constant 0 : index
    %49 = vector.load %arg12[%c16_26, %c0_27] : memref<288x12xbf16, #tpu.memory_space<vmem>>, vector<256x12xbf16>
    %c1 = arith.constant 1 : index
    %c0_28 = arith.constant 0 : index
    %c0_29 = arith.constant 0 : index
    %50 = vector.load %arg3[%c1, %c0_28, %c0_29] : memref<3x12x4xbf16, #tpu.memory_space<vmem>>, vector<1x12x4xbf16>
    %51 = vector.shape_cast %50 : vector<1x12x4xbf16> to vector<12x4xbf16>
    %cst_30 = arith.constant dense<0.000000e+00> : vector<256x4xf32>
    %52 = tpu.matmul %49, %51, %cst_30 {dimension_numbers = #tpu.dot_dimension_numbers<[1], [0], [0], [1], [0, 0, 1, 1], [], []>} : vector<256x12xbf16>, vector<12x4xbf16>, vector<256x4xf32> -> vector<256x4xf32>
    %53 = arith.addf %48, %52 : vector<256x4xf32>
    %c17 = arith.constant 17 : index
    %c0_31 = arith.constant 0 : index
    %54 = vector.load %arg12[%c17, %c0_31] : memref<288x12xbf16, #tpu.memory_space<vmem>>, vector<256x12xbf16>
    %cst_32 = arith.constant 0.000000e+00 : bf16
    %55 = vector.broadcast %cst_32 : bf16 to vector<256x12xbf16>
    %56 = arith.select %40, %54, %55 : vector<256x12xi1>, vector<256x12xbf16>
    %c2 = arith.constant 2 : index
    %c0_33 = arith.constant 0 : index
    %c0_34 = arith.constant 0 : index
    %57 = vector.load %arg3[%c2, %c0_33, %c0_34] : memref<3x12x4xbf16, #tpu.memory_space<vmem>>, vector<1x12x4xbf16>
    %58 = vector.shape_cast %57 : vector<1x12x4xbf16> to vector<12x4xbf16>
    %cst_35 = arith.constant dense<0.000000e+00> : vector<256x4xf32>
    %59 = tpu.matmul %56, %58, %cst_35 {dimension_numbers = #tpu.dot_dimension_numbers<[1], [0], [0], [1], [0, 0, 1, 1], [], []>} : vector<256x12xbf16>, vector<12x4xbf16>, vector<256x4xf32> -> vector<256x4xf32>
    %60 = arith.addf %53, %59 : vector<256x4xf32>
    %c0_36 = arith.constant 0 : index
    %c0_37 = arith.constant 0 : index
    %61 = vector.load %arg7[%c0_36, %c0_37] : memref<1x4xf32, #tpu.memory_space<vmem>>, vector<1x4xf32>
    %62 = vector.broadcast %61 : vector<1x4xf32> to vector<256x4xf32>
    %63 = arith.mulf %60, %62 : vector<256x4xf32>
    %c0_38 = arith.constant 0 : index
    %c0_39 = arith.constant 0 : index
    %64 = vector.load %arg8[%c0_38, %c0_39] : memref<1x4xf32, #tpu.memory_space<vmem>>, vector<1x4xf32>
    %65 = vector.broadcast %64 : vector<1x4xf32> to vector<256x4xf32>
    %66 = arith.addf %63, %65 : vector<256x4xf32>
    %cst_40 = arith.constant 0.000000e+00 : f32
    %67 = vector.broadcast %cst_40 : f32 to vector<256x4xf32>
    %68 = arith.maximumf %66, %67 : vector<256x4xf32>
    %69 = arith.truncf %68 : vector<256x4xf32> to vector<256x4xbf16>
    %c0_41 = arith.constant 0 : index
    %c0_42 = arith.constant 0 : index
    %70 = vector.load %arg4[%c0_41, %c0_42] : memref<4x128xbf16, #tpu.memory_space<vmem>>, vector<4x128xbf16>
    %cst_43 = arith.constant dense<0.000000e+00> : vector<256x128xf32>
    %71 = tpu.matmul %69, %70, %cst_43 {dimension_numbers = #tpu.dot_dimension_numbers<[1], [0], [0], [1], [0, 0, 1, 1], [], []>} : vector<256x4xbf16>, vector<4x128xbf16>, vector<256x128xf32> -> vector<256x128xf32>
    %c0_44 = arith.constant 0 : index
    %c0_45 = arith.constant 0 : index
    %72 = vector.load %arg9[%c0_44, %c0_45] : memref<1x128xf32, #tpu.memory_space<vmem>>, vector<1x128xf32>
    %73 = vector.broadcast %72 : vector<1x128xf32> to vector<256x128xf32>
    %74 = arith.mulf %71, %73 : vector<256x128xf32>
    %c0_46 = arith.constant 0 : index
    %c0_47 = arith.constant 0 : index
    %75 = vector.load %arg10[%c0_46, %c0_47] : memref<1x128xf32, #tpu.memory_space<vmem>>, vector<1x128xf32>
    %76 = vector.broadcast %75 : vector<1x128xf32> to vector<256x128xf32>
    %77 = arith.addf %74, %76 : vector<256x128xf32>
    %78 = arith.addf %77, %1 : vector<256x128xf32>
    %cst_48 = arith.constant 0.000000e+00 : f32
    %79 = vector.broadcast %cst_48 : f32 to vector<256x128xf32>
    %80 = arith.maximumf %78, %79 : vector<256x128xf32>
    %c0_49 = arith.constant 0 : index
    %c0_50 = arith.constant 0 : index
    %c0_51 = arith.constant 0 : index
    %81 = vector.load %arg11[%c0_49, %c0_50, %c0_51] : memref<1x256x128xf32, #tpu.memory_space<vmem>>, vector<1x256x128xf32>
    %82 = vector.shape_cast %81 : vector<1x256x128xf32> to vector<256x128xf32>
    %83 = vector.shape_cast %80 : vector<256x128xf32> to vector<1x256x128xf32>
    tpu.vector_store %arg11[%c0_49, %c0_50, %c0_51], %83 {strides = array<i32>} : memref<1x256x128xf32, #tpu.memory_space<vmem>>, vector<1x256x128xf32>,
    return
  }
  func.func @transform_0(%arg0: i32) -> (i32, i32, i32) {
    %c0_i32 = arith.constant 0 : i32
    %c0_i32_0 = arith.constant 0 : i32
    %c0_i32_1 = arith.constant 0 : i32
    return %arg0, %c0_i32, %c0_i32_0 : i32, i32, i32
  }
  func.func @transform_1(%arg0: i32) -> (i32, i32) {
    %c0_i32 = arith.constant 0 : i32
    %c0_i32_0 = arith.constant 0 : i32
    %c0_i32_1 = arith.constant 0 : i32
    return %c0_i32, %c0_i32_0 : i32, i32
  }
  func.func @transform_2(%arg0: i32) -> (i32, i32, i32) {
    %c0_i32 = arith.constant 0 : i32
    %c0_i32_0 = arith.constant 0 : i32
    %c0_i32_1 = arith.constant 0 : i32
    %c0_i32_2 = arith.constant 0 : i32
    return %c0_i32, %c0_i32_0, %c0_i32_1 : i32, i32, i32
  }
  func.func @transform_3(%arg0: i32) -> (i32, i32) {
    %c0_i32 = arith.constant 0 : i32
    %c0_i32_0 = arith.constant 0 : i32
    %c0_i32_1 = arith.constant 0 : i32
    return %c0_i32, %c0_i32_0 : i32, i32
  }
  func.func @transform_4(%arg0: i32) -> (i32, i32) {
    %c0_i32 = arith.constant 0 : i32
    %c0_i32_0 = arith.constant 0 : i32
    %c0_i32_1 = arith.constant 0 : i32
    return %c0_i32, %c0_i32_0 : i32, i32
  }
  func.func @transform_5(%arg0: i32) -> (i32, i32) {
    %c0_i32 = arith.constant 0 : i32
    %c0_i32_0 = arith.constant 0 : i32
    %c0_i32_1 = arith.constant 0 : i32
    return %c0_i32, %c0_i32_0 : i32, i32
  }
  func.func @transform_6(%arg0: i32) -> (i32, i32) {
    %c0_i32 = arith.constant 0 : i32
    %c0_i32_0 = arith.constant 0 : i32
    %c0_i32_1 = arith.constant 0 : i32
    return %c0_i32, %c0_i32_0 : i32, i32
  }
  func.func @transform_7(%arg0: i32) -> (i32, i32) {
    %c0_i32 = arith.constant 0 : i32
    %c0_i32_0 = arith.constant 0 : i32
    %c0_i32_1 = arith.constant 0 : i32
    return %c0_i32, %c0_i32_0 : i32, i32
  }
  func.func @transform_8(%arg0: i32) -> (i32, i32) {
    %c0_i32 = arith.constant 0 : i32
    %c0_i32_0 = arith.constant 0 : i32
    %c0_i32_1 = arith.constant 0 : i32
    return %c0_i32, %c0_i32_0 : i32, i32
  }
  func.func @transform_9(%arg0: i32) -> (i32, i32) {
    %c0_i32 = arith.constant 0 : i32
    %c0_i32_0 = arith.constant 0 : i32
    %c0_i32_1 = arith.constant 0 : i32
    return %c0_i32, %c0_i32_0 : i32, i32
  }
  func.func @transform_10(%arg0: i32) -> (i32, i32, i32) {
    %c0_i32 = arith.constant 0 : i32
    %c0_i32_0 = arith.constant 0 : i32
    %c0_i32_1 = arith.constant 0 : i32
    return %arg0, %c0_i32, %c0_i32_0 : i32, i32, i32
  }
}

</mosaic_0001>

<bundles_post_ra>
// kernel: bottleneck_forward.1
= control target key start
LH: loop header
LB: loop body
LE: loop exit
PB: predicated region body
PF: predicated region fallthrough
CT: control target
= control target key end

     0   :  { %s4117_s13 = smov 0   ;;  %s5505_s0 = inlined_call_operand.vmem [shape: f32[2,256,128], index: 0, kind: input, shape index: {}]   ;;  %s5506_s1 = inlined_call_operand.vmem [shape: bf16[128,4], index: 1, kind: input, shape index: {}]   ;;  %s5507_s2 = inlined_call_operand.vmem [shape: bf16[3,12,4], index: 2, kind: input, shape index: {}]   ;;  %s5508_s3 = inlined_call_operand.vmem [shape: bf16[4,128], index: 3, kind: input, shape index: {}]   ;;  %s5509_s4 = inlined_call_operand.vmem [shape: f32[1,4], index: 4, kind: input, shape index: {}]   ;;  %s5510_s5 = inlined_call_operand.vmem [shape: f32[1,4], index: 5, kind: input, shape index: {}]   ;;  %s5511_s6 = inlined_call_operand.vmem [shape: f32[1,4], index: 6, kind: input, shape index: {}]   ;;  %s5512_s7 = inlined_call_operand.vmem [shape: f32[1,4], index: 7, kind: input, shape index: {}]   ;;  %s5513_s8 = inlined_call_operand.vmem [shape: f32[1,128], index: 8, kind: input, shape index: {}]   ;;  %s5514_s9 = inlined_call_operand.vmem [shape: f32[1,128], index: 9, kind: input, shape index: {}]   ;;  %s5515_s10 = inlined_call_operand.vmem [shape: f32[2,256,128], index: 10, kind: output, shape index: {}]  }
   0x1 LB: > { %s3518_s14 = sadd.s32 4294967295, %s4056_s13   ;;  %p3522_p0 = scmp.ge.s32.totalorder %s4056_s13, 1  ;;  %s4056_s13 = sphi %s4117_s13, %s20_s13  }
   0x2   : > { %p312_p1 = scmp.lt.s32.totalorder %s4056_s13, 3 }
   0x4   : > { %p313_p2 = pnand %p3522_p0, %p312_p1 }
   0x6   : > { %316 = sbr.rel (%p313_p2) target bundleno = 1041 (0x411), region = 60 }
   0xd   : > { %v4007_v0 = vld [vmem:[%s5506_s1] sm:$0xff]   ;;  %p350_p3 = scmp.lt.s32.totalorder %s3518_s14, 1  ;;  %v4008_v1 = vld [vmem:[%s5506_s1 + $0x8] sm:$0xff]   ;;  %v4009_v2 = vld [vmem:[%s5506_s1 + $0x10] sm:$0xff]   ;;  %vm762_vm0 = vcmask 97280   ;;  %v5517_v56 = vmov 0  }
   0xe   : > { %3740 = vmatprep.subr.bf16.mxu0 %v4007_v0  ;;  %v4010_v3 = vld [vmem:[%s5506_s1 + $0x18] sm:$0xff]   ;;  %v4011_v7 = vld [vmem:[%s5506_s1 + $0x20] sm:$0xff]   ;;  %v4012_v8 = vld [vmem:[%s5506_s1 + $0x28] sm:$0xff]   ;;  %766 = vst.msk [vmem:[#allocation2 + $0x88] sm:$0xff] %vm762_vm0, %v5517_v56  ;;  %vm5516_vm1 = vcmask 31744   ;;  %s4059_s22 = smov 4  }
   0xf   : > { %s5618_s14 = smov (!%p350_p3, %s3518_s14), 1  ;;  %3741 = vmatpush3.bf16.msra.mxu0 %v4007_v0  ;;  %v4013_v9 = vld [vmem:[%s5506_s1 + $0x30] sm:$0xff]   ;;  %v4014_v10 = vld [vmem:[%s5506_s1 + $0x38] sm:$0xff]   ;;  %763 = vst.msk [vmem:[#allocation2] sm:$0xff] %vm762_vm0, %v5517_v56  ;;  %764 = vst.msk [vmem:[#allocation2 + $0x8] sm:$0xff] %vm762_vm0, %v5517_v56  ;;  %s4060_s23 = smov 8  }
  0x10   : > { %3742 = vmatprep.subr.bf16.mxu0 %v4008_v1  ;;  %s3646_s21 = sshll.u32 %s5618_s14, 8  ;;  %765 = vst.msk [vmem:[#allocation2 + $0x80] sm:$0xff] %vm762_vm0, %v5517_v56  ;;  %v4202_v57 = vld [vmem:[%s5509_s4] ss:$0 sm:$0xff]  ;;  %vm1760_vm2 = vcmask 1045504   ;;  %vm4061_vm6 = vmmov 1  }
  0x11   : > { %s4142_s24 = scalar_lea.vmem %s5505_s0, %s3646_s21  ;;  %v4207_v59 = vld [vmem:[%s5510_s5] ss:$0 sm:$0xff]  ;;  %vm1429_vm7 = vmpackc.low %vm4061_vm6, %vm4061_vm6  ;;  %s5380_s27 = scalar_lea.vmem %s5515_s10, %s3646_s21 }
  0x12   : > { %v363_v4 = vld [vmem:[%s4142_s24] sm:$0xff]  ;;  %v364_v5 = vld [vmem:[%s4142_s24 + $0x8] sm:$0xff]  ;;  %v365_v11 = vld [vmem:[%s4142_s24 + $0x10] sm:$0xff] }
  0x13   : > { %3743 = vmatpush3.bf16.msra.mxu0 %v4008_v1  ;;  %v395_v6 = vpack.c.bf16 %v364_v5, %v363_v4  ;;  %v366_v12 = vld [vmem:[%s4142_s24 + $0x18] sm:$0xff]  ;;  %v367_v13 = vld [vmem:[%s4142_s24 + $0x20] sm:$0xff]  ;;  %v368_v14 = vld [vmem:[%s4142_s24 + $0x28] sm:$0xff] }
  0x14   : > { %3744 = vmatprep.subr.bf16.mxu0 %v4009_v2  ;;  %v396_v15 = vpack.c.bf16 %v366_v12, %v365_v11  ;;  %v397_v16 = vpack.c.bf16 %v368_v14, %v367_v13  ;;  %v369_v17 = vld [vmem:[%s4142_s24 + $0x30] sm:$0xff]  ;;  %v370_v18 = vld [vmem:[%s4142_s24 + $0x38] sm:$0xff]  ;;  %v371_v19 = vld [vmem:[%s4142_s24 + $0x40] sm:$0xff] }
  0x15   : > { %3756 = vmatprep.mubr.bf16.mxu0 %v395_v6  ;;  %v372_v20 = vld [vmem:[%s4142_s24 + $0x48] sm:$0xff]  ;;  %v398_v21 = vpack.c.bf16 %v370_v18, %v369_v17  ;;  %v373_v23 = vld [vmem:[%s4142_s24 + $0x50] sm:$0xff]  ;;  %v374_v24 = vld [vmem:[%s4142_s24 + $0x58] sm:$0xff] }
  0x16   : > { %v399_v22 = vpack.c.bf16 %v372_v20, %v371_v19  ;;  %v375_v25 = vld [vmem:[%s4142_s24 + $0x60] sm:$0xff]  ;;  %v376_v26 = vld [vmem:[%s4142_s24 + $0x68] sm:$0xff]  ;;  %v400_v27 = vpack.c.bf16 %v374_v24, %v373_v23  ;;  %v377_v29 = vld [vmem:[%s4142_s24 + $0x70] sm:$0xff] }
  0x17   : > { %3745 = vmatpush3.bf16.msra.mxu0 %v4009_v2  ;;  %v401_v28 = vpack.c.bf16 %v376_v26, %v375_v25  ;;  %v378_v30 = vld [vmem:[%s4142_s24 + $0x78] sm:$0xff]  ;;  %v379_v31 = vld [vmem:[%s4142_s24 + $0x80] sm:$0xff]  ;;  %v380_v32 = vld [vmem:[%s4142_s24 + $0x88] sm:$0xff] }
  0x18   : > { %3746 = vmatprep.subr.bf16.mxu0 %v4010_v3  ;;  %v402_v33 = vpack.c.bf16 %v378_v30, %v377_v29  ;;  %v403_v34 = vpack.c.bf16 %v380_v32, %v379_v31  ;;  %v381_v35 = vld [vmem:[%s4142_s24 + $0x90] sm:$0xff]  ;;  %v382_v36 = vld [vmem:[%s4142_s24 + $0x98] sm:$0xff]  ;;  %v383_v37 = vld [vmem:[%s4142_s24 + $0xa0] sm:$0xff] }
  0x19   : > { %v384_v38 = vld [vmem:[%s4142_s24 + $0xa8] sm:$0xff]  ;;  %v404_v39 = vpack.c.bf16 %v382_v36, %v381_v35  ;;  %v385_v41 = vld [vmem:[%s4142_s24 + $0xb0] sm:$0xff]  ;;  %v386_v42 = vld [vmem:[%s4142_s24 + $0xb8] sm:$0xff] }
  0x1a   : > { %v405_v40 = vpack.c.bf16 %v384_v38, %v383_v37  ;;  %v387_v43 = vld [vmem:[%s4142_s24 + $0xc0] sm:$0xff]  ;;  %v388_v44 = vld [vmem:[%s4142_s24 + $0xc8] sm:$0xff]  ;;  %v406_v45 = vpack.c.bf16 %v386_v42, %v385_v41  ;;  %v389_v47 = vld [vmem:[%s4142_s24 + $0xd0] sm:$0xff] }
  0x1b   : > { %3747 = vmatpush3.bf16.msra.mxu0 %v4010_v3  ;;  %v407_v46 = vpack.c.bf16 %v388_v44, %v387_v43  ;;  %v390_v48 = vld [vmem:[%s4142_s24 + $0xd8] sm:$0xff]  ;;  %v391_v49 = vld [vmem:[%s4142_s24 + $0xe0] sm:$0xff]  ;;  %v392_v50 = vld [vmem:[%s4142_s24 + $0xe8] sm:$0xff] }
  0x1c   : > { %3748 = vmatprep.subr.bf16.mxu0 %v4011_v7  ;;  %v408_v51 = vpack.c.bf16 %v390_v48, %v389_v47  ;;  %v409_v52 = vpack.c.bf16 %v392_v50, %v391_v49  ;;  %v393_v53 = vld [vmem:[%s4142_s24 + $0xf0] sm:$0xff]  ;;  %v394_v54 = vld [vmem:[%s4142_s24 + $0xf8] sm:$0xff] }
  0x1d   : > { %v410_v55 = vpack.c.bf16 %v394_v54, %v393_v53 }
  0x1f   : > { %3749 = vmatpush3.bf16.msra.mxu0 %v4011_v7 }
  0x20   : > { %3750 = vmatprep.subr.bf16.mxu0 %v4012_v8 }
  0x23   : > { %3751 = vmatpush3.bf16.msra.mxu0 %v4012_v8 }
  0x24   : > { %3752 = vmatprep.subr.bf16.mxu0 %v4013_v9 }
  0x27   : > { %3753 = vmatpush3.bf16.msra.mxu0 %v4013_v9 }
  0x28   : > { %3754 = vmatprep.subr.bf16.mxu0 %v4014_v10 }
  0x2b   : > { %3755 = vmatpush3.bf16.msra.mxu0 %v4014_v10 }
  0x2e   : > { %3757 = vmatmul.mubr.bf16.vlgmr.msra.gmra.mrb[0].mxu0 %v396_v15 }
  0x2f   : > { %3760 = vmatprep.mubr.bf16.mxu0 %v397_v16 }
  0x36   : > { %3761 = vmatmul.mubr.bf16.gmra.mrb[4].mxu0 %v398_v21 }
  0x37   : > { %3764 = vmatprep.mubr.bf16.mxu0 %v399_v22 }
  0x3e   : > { %3765 = vmatmul.mubr.bf16.gmra.mrb[8].mxu0 %v400_v27 }
  0x3f   : > { %3768 = vmatprep.mubr.bf16.mxu0 %v401_v28 }
  0x46   : > { %3769 = vmatmul.mubr.bf16.gmra.mrb[12].mxu0 %v402_v33 }
  0x47   : > { %3772 = vmatprep.mubr.bf16.mxu0 %v403_v34 }
  0x4e   : > { %3773 = vmatmul.mubr.bf16.gmra.mrb[16].mxu0 %v404_v39 }
  0x4f   : > { %3776 = vmatprep.mubr.bf16.mxu0 %v405_v40 }
  0x56   : > { %3777 = vmatmul.mubr.bf16.gmra.mrb[20].mxu0 %v406_v45 }
  0x57   : > { %3780 = vmatprep.mubr.bf16.mxu0 %v407_v46 }
  0x5e   : > { %3781 = vmatmul.mubr.bf16.gmra.mrb[24].mxu0 %v408_v51 }
  0x5f   : > { %3784 = vmatprep.mubr.bf16.mxu0 %v409_v52 }
  0x66   : > { %3785 = vmatmul.mubr.bf16.gmra.mrb[28].mxu0 %v410_v55 }
 0x101   : > { %v3758_v58 = vpop.f32.mrb[0].mxu0 }
 0x102   : > { %v645_v60 = vmul.f32 %v3758_v58, %v4202_v57  ;;  %v509_v61 = vpop.f32.mrb[1].mxu0 }
 0x103   : > { %v643_v62 = vmul.f32 %v4202_v57, %v509_v61  ;;  %v3759_v63 = vpop.f32.mrb[2].mxu0 }
 0x104   : > { %v684_v0 = vadd.f32 %v4207_v59, %v645_v60  ;;  %v646_v1 = vmul.f32 %v3759_v63, %v4202_v57  ;;  %v512_v2 = vpop.f32.mrb[3].mxu0 }
 0x105   : > { %v682_v3 = vadd.f32 %v4207_v59, %v643_v62  ;;  %v644_v4 = vmul.f32 %v4202_v57, %v512_v2  ;;  %v4015_v62 = vld [vmem:[%s5507_s2 + $0x8] sm:$0x3f]  }
 0x106   : > { %v685_v5 = vadd.f32 %v4207_v59, %v646_v1  ;;  %v716_v7 = vmax.f32 %v684_v0, 0.0  ;;  %3991 = vmatprep.subr.msk.bf16.mxu1 %vm1760_vm2, %v4015_v62  ;;  %v1762_v1 = vsel %vm1760_vm2, %v4015_v62, 0  ;;  %3990 = vmatprep.subr.msk.bf16.mxu0 %vm1760_vm2, %v4015_v62 }
 0x107   : > { %v683_v6 = vadd.f32 %v4207_v59, %v644_v4  ;;  %v714_v9 = vmax.f32 %v682_v3, 0.0  ;;  %3925 = vmatpush3.bf16.msra.mxu1 %v1762_v1  ;;  %3789 = vmatpush3.bf16.msra.mxu0 %v1762_v1 }
 0x108   : > { %v717_v8 = vmax.f32 %v685_v5, 0.0 }
 0x109   : > { %v715_v10 = vmax.f32 %v683_v6, 0.0  ;;  %v3762_v11 = vpop.f32.mrb[4].mxu0 }
 0x10a   : > { %v649_v12 = vmul.f32 %v3762_v11, %v4202_v57  ;;  %v525_v13 = vpop.f32.mrb[5].mxu0  ;;  %v4218_v14 = vpack.c.bf16 %v717_v8, %v716_v7 }
 0x10b   : > { %v647_v15 = vmul.f32 %v4202_v57, %v525_v13  ;;  %v3763_v16 = vpop.f32.mrb[6].mxu0  ;;  %v4221_v17 = vpack.c.bf16 %v715_v10, %v714_v9 }
 0x10c   : > { %v688_v18 = vadd.f32 %v4207_v59, %v649_v12  ;;  %v650_v19 = vmul.f32 %v3763_v16, %v4202_v57  ;;  %v528_v20 = vpop.f32.mrb[7].mxu0  ;;  %769 = vst.msk [vmem:[#allocation2 + $0x18] sm:$0xff] %vm5516_vm1, %v4218_v14 }
 0x10d   : > { %v686_v21 = vadd.f32 %v4207_v59, %v647_v15  ;;  %v648_v22 = vmul.f32 %v4202_v57, %v528_v20  ;;  %800 = vrot.lane.b32.xlu0 %v4221_v17, %s4059_s22  ;;  %768 = vst.msk [vmem:[#allocation2 + $0x10] sm:$0xff] %vm5516_vm1, %v4221_v17 }
 0x10e   : > { %v689_v23 = vadd.f32 %v4207_v59, %v650_v19  ;;  %v720_v25 = vmax.f32 %v688_v18, 0.0 }
 0x10f   : > { %v687_v24 = vadd.f32 %v4207_v59, %v648_v22  ;;  %v718_v27 = vmax.f32 %v686_v21, 0.0 }
 0x110   : > { %v721_v26 = vmax.f32 %v689_v23, 0.0 }
 0x111   : > { %v719_v28 = vmax.f32 %v687_v24, 0.0  ;;  %v3766_v29 = vpop.f32.mrb[8].mxu0 }
 0x112   : > { %v653_v30 = vmul.f32 %v3766_v29, %v4202_v57  ;;  %v541_v31 = vpop.f32.mrb[9].mxu0  ;;  %v4236_v32 = vpack.c.bf16 %v721_v26, %v720_v25 }
 0x113   : > { %v651_v33 = vmul.f32 %v4202_v57, %v541_v31  ;;  %v3767_v34 = vpop.f32.mrb[10].mxu0  ;;  %v4239_v35 = vpack.c.bf16 %v719_v28, %v718_v27  ;;  %v4291_v27 = vld [vmem:[%s5507_s2] sm:$0x3f]  }
 0x114   : > { %v692_v36 = vadd.f32 %v4207_v59, %v653_v30  ;;  %v654_v37 = vmul.f32 %v3767_v34, %v4202_v57  ;;  %v544_v38 = vpop.f32.mrb[11].mxu0  ;;  %771 = vst.msk [vmem:[#allocation2 + $0x28] sm:$0xff] %vm5516_vm1, %v4236_v32  ;;  %3992 = vmatprep.subr.msk.bf16.mxu1 %vm1760_vm2, %v4291_v27 }
 0x115   : > { %v690_v39 = vadd.f32 %v4207_v59, %v651_v33  ;;  %v652_v40 = vmul.f32 %v4202_v57, %v544_v38  ;;  %770 = vst.msk [vmem:[#allocation2 + $0x20] sm:$0xff] %vm5516_vm1, %v4239_v35 }
 0x116   : > { %v693_v41 = vadd.f32 %v4207_v59, %v654_v37  ;;  %v724_v43 = vmax.f32 %v692_v36, 0.0 }
 0x117   : > { %v691_v42 = vadd.f32 %v4207_v59, %v652_v40  ;;  %v722_v45 = vmax.f32 %v690_v39, 0.0 }
 0x118   : > { %v725_v44 = vmax.f32 %v693_v41, 0.0 }
 0x119   : > { %v723_v46 = vmax.f32 %v691_v42, 0.0  ;;  %v3770_v47 = vpop.f32.mrb[12].mxu0 }
 0x11a   : > { %v657_v48 = vmul.f32 %v3770_v47, %v4202_v57  ;;  %v557_v49 = vpop.f32.mrb[13].mxu0  ;;  %v751_v50 = vpack.c.bf16 %v725_v44, %v724_v43 }
 0x11b   : > { %v655_v51 = vmul.f32 %v4202_v57, %v557_v49  ;;  %v3771_v52 = vpop.f32.mrb[14].mxu0  ;;  %v4253_v53 = vpack.c.bf16 %v723_v46, %v722_v45 }
 0x11c   : > { %v696_v54 = vadd.f32 %v4207_v59, %v657_v48  ;;  %v658_v55 = vmul.f32 %v3771_v52, %v4202_v57  ;;  %875 = vrot.lane.b32.xlu1 %v751_v50, %s4060_s23  ;;  %810 = vrot.lane.b32.xlu0 %v751_v50, %s4059_s22  ;;  %v560_v58 = vpop.f32.mrb[15].mxu0  ;;  %773 = vst.msk [vmem:[#allocation2 + $0x38] sm:$0xff] %vm5516_vm1, %v751_v50 }
 0x11d   : > { %v694_v60 = vadd.f32 %v4207_v59, %v655_v51  ;;  %v656_v61 = vmul.f32 %v4202_v57, %v560_v58  ;;  %772 = vst.msk [vmem:[#allocation2 + $0x30] sm:$0xff] %vm5516_vm1, %v4253_v53 }
 0x11e   : > { %v697_v63 = vadd.f32 %v4207_v59, %v658_v55  ;;  %v728_v2 = vmax.f32 %v696_v54, 0.0 }
 0x11f   : > { %v695_v0 = vadd.f32 %v4207_v59, %v656_v61  ;;  %v726_v4 = vmax.f32 %v694_v60, 0.0 }
 0x120   : > { %v729_v3 = vmax.f32 %v697_v63, 0.0  ;;  %808 = vrot.lane.b32.xlu0 %v4253_v53, %s4059_s22 }
 0x121   : > { %v727_v5 = vmax.f32 %v695_v0, 0.0  ;;  %v3774_v6 = vpop.f32.mrb[16].mxu0 }
 0x122   : > { %v661_v7 = vmul.f32 %v3774_v6, %v4202_v57  ;;  %v573_v8 = vpop.f32.mrb[17].mxu0  ;;  %v753_v9 = vpack.c.bf16 %v729_v3, %v728_v2 }
 0x123   : > { %v659_v10 = vmul.f32 %v4202_v57, %v573_v8  ;;  %v3775_v11 = vpop.f32.mrb[18].mxu0  ;;  %v752_v12 = vpack.c.bf16 %v727_v5, %v726_v4 }
 0x124   : > { %v700_v13 = vadd.f32 %v4207_v59, %v661_v7  ;;  %v662_v15 = vmul.f32 %v3775_v11, %v4202_v57  ;;  %879 = vrot.lane.b32.xlu0 %v753_v9, %s4060_s23  ;;  %814 = vrot.lane.b32.xlu1 %v753_v9, %s4059_s22  ;;  %v576_v16 = vpop.f32.mrb[19].mxu0  ;;  %775 = vst.msk [vmem:[#allocation2 + $0x48] sm:$0xff] %vm5516_vm1, %v753_v9 }
 0x125   : > { %v698_v18 = vadd.f32 %v4207_v59, %v659_v10  ;;  %v660_v19 = vmul.f32 %v4202_v57, %v576_v16  ;;  %774 = vst.msk [vmem:[#allocation2 + $0x40] sm:$0xff] %vm5516_vm1, %v752_v12 }
 0x126   : > { %v701_v20 = vadd.f32 %v4207_v59, %v662_v15  ;;  %v732_v22 = vmax.f32 %v700_v13, 0.0 }
 0x127   : > { %v699_v21 = vadd.f32 %v4207_v59, %v660_v19  ;;  %v730_v24 = vmax.f32 %v698_v18, 0.0 }
 0x128   : > { %v733_v23 = vmax.f32 %v701_v20, 0.0  ;;  %812 = vrot.lane.b32.xlu0 %v752_v12, %s4059_s22  ;;  %877 = vrot.lane.b32.xlu1 %v752_v12, %s4060_s23 }
 0x129   : > { %v731_v25 = vmax.f32 %v699_v21, 0.0  ;;  %v3778_v26 = vpop.f32.mrb[20].mxu0 }
 0x12a   : > { %v665_v28 = vmul.f32 %v3778_v26, %v4202_v57  ;;  %v589_v29 = vpop.f32.mrb[21].mxu0  ;;  %v755_v30 = vpack.c.bf16 %v733_v23, %v732_v22 }
 0x12b   : > { %v663_v31 = vmul.f32 %v4202_v57, %v589_v29  ;;  %v3779_v33 = vpop.f32.mrb[22].mxu0  ;;  %v754_v34 = vpack.c.bf16 %v731_v25, %v730_v24 }
 0x12c   : > { %v704_v36 = vadd.f32 %v4207_v59, %v665_v28  ;;  %v666_v37 = vmul.f32 %v3779_v33, %v4202_v57  ;;  %883 = vrot.lane.b32.xlu0 %v755_v30, %s4060_s23  ;;  %818 = vrot.lane.b32.xlu1 %v755_v30, %s4059_s22  ;;  %v592_v38 = vpop.f32.mrb[23].mxu0  ;;  %777 = vst.msk [vmem:[#allocation2 + $0x58] sm:$0xff] %vm5516_vm1, %v755_v30 }
 0x12d   : > { %v702_v39 = vadd.f32 %v4207_v59, %v663_v31  ;;  %v664_v40 = vmul.f32 %v4202_v57, %v592_v38  ;;  %776 = vst.msk [vmem:[#allocation2 + $0x50] sm:$0xff] %vm5516_vm1, %v754_v34 }
 0x12e   : > { %v705_v41 = vadd.f32 %v4207_v59, %v666_v37  ;;  %v736_v43 = vmax.f32 %v704_v36, 0.0 }
 0x12f   : > { %v703_v42 = vadd.f32 %v4207_v59, %v664_v40  ;;  %v734_v45 = vmax.f32 %v702_v39, 0.0  ;;  %v4382_v39 = vsel %vm1429_vm7, 65537, %v5517_v56 }
 0x130   : > { %v737_v44 = vmax.f32 %v705_v41, 0.0  ;;  %816 = vrot.lane.b32.xlu0 %v754_v34, %s4059_s22  ;;  %881 = vrot.lane.b32.xlu1 %v754_v34, %s4060_s23 }
 0x131   : > { %v735_v46 = vmax.f32 %v703_v42, 0.0  ;;  %v3782_v47 = vpop.f32.mrb[24].mxu0 }
 0x132   : > { %v669_v48 = vmul.f32 %v3782_v47, %v4202_v57  ;;  %v605_v49 = vpop.f32.mrb[25].mxu0  ;;  %v757_v50 = vpack.c.bf16 %v737_v44, %v736_v43 }
 0x133   : > { %v667_v51 = vmul.f32 %v4202_v57, %v605_v49  ;;  %v3783_v52 = vpop.f32.mrb[26].mxu0  ;;  %v756_v54 = vpack.c.bf16 %v735_v46, %v734_v45 }
 0x134   : > { %v708_v55 = vadd.f32 %v4207_v59, %v669_v48  ;;  %v670_v58 = vmul.f32 %v3783_v52, %v4202_v57  ;;  %887 = vrot.lane.b32.xlu0 %v757_v50, %s4060_s23  ;;  %822 = vrot.lane.b32.xlu1 %v757_v50, %s4059_s22  ;;  %v608_v60 = vpop.f32.mrb[27].mxu0  ;;  %779 = vst.msk [vmem:[#allocation2 + $0x68] sm:$0xff] %vm5516_vm1, %v757_v50 }
 0x135   : > { %v706_v61 = vadd.f32 %v4207_v59, %v667_v51  ;;  %v668_v62 = vmul.f32 %v4202_v57, %v608_v60  ;;  %778 = vst.msk [vmem:[#allocation2 + $0x60] sm:$0xff] %vm5516_vm1, %v756_v54 }
 0x136   : > { %v709_v63 = vadd.f32 %v4207_v59, %v670_v58  ;;  %v740_v1 = vmax.f32 %v708_v55, 0.0 }
 0x137   : > { %v707_v0 = vadd.f32 %v4207_v59, %v668_v62  ;;  %v738_v3 = vmax.f32 %v706_v61, 0.0  ;;  %v4504_v62 = vsel %vm1760_vm2, %v4291_v27, 0 }
 0x138   : > { %v741_v2 = vmax.f32 %v709_v63, 0.0  ;;  %820 = vrot.lane.b32.xlu0 %v756_v54, %s4059_s22  ;;  %885 = vrot.lane.b32.xlu1 %v756_v54, %s4060_s23 }
 0x139   : > { %v739_v4 = vmax.f32 %v707_v0, 0.0  ;;  %v3786_v5 = vpop.f32.mrb[28].mxu0 }
 0x13a   : > { %v673_v6 = vmul.f32 %v3786_v5, %v4202_v57  ;;  %v621_v7 = vpop.f32.mrb[29].mxu0  ;;  %v759_v8 = vpack.c.bf16 %v741_v2, %v740_v1 }
 0x13b   : > { %v671_v9 = vmul.f32 %v4202_v57, %v621_v7  ;;  %v3787_v10 = vpop.f32.mrb[30].mxu0  ;;  %v758_v11 = vpack.c.bf16 %v739_v4, %v738_v3 }
 0x13c   : > { %v712_v12 = vadd.f32 %v4207_v59, %v673_v6  ;;  %891 = vrot.lane.b32.xlu0 %v759_v8, %s4060_s23  ;;  %826 = vrot.lane.b32.xlu1 %v759_v8, %s4059_s22  ;;  %v674_v13 = vmul.f32 %v3787_v10, %v4202_v57  ;;  %v624_v15 = vpop.f32.mrb[31].mxu0  ;;  %781 = vst.msk [vmem:[#allocation2 + $0x78] sm:$0xff] %vm5516_vm1, %v759_v8 }
 0x13d   : > { %v710_v16 = vadd.f32 %v4207_v59, %v671_v9  ;;  %v672_v18 = vmul.f32 %v4202_v57, %v624_v15  ;;  %780 = vst.msk [vmem:[#allocation2 + $0x70] sm:$0xff] %vm5516_vm1, %v758_v11  ;;  %v930_v57 = vlaneseq }
 0x13e   : > { %v744_v19 = vmax.f32 %v712_v12, 0.0  ;;  %v713_v20 = vadd.f32 %v4207_v59, %v674_v13 }
 0x13f   : > { %v742_v21 = vmax.f32 %v710_v16, 0.0  ;;  %v711_v22 = vadd.f32 %v4207_v59, %v672_v18  ;;  %v4359_v59 = vshrl.u32 %v930_v57, 7 }
 0x140   : > { %v745_v23 = vmax.f32 %v713_v20, 0.0  ;;  %824 = vrot.lane.b32.xlu0 %v758_v11, %s4059_s22  ;;  %889 = vrot.lane.b32.xlu1 %v758_v11, %s4060_s23 }
 0x141   : > { %v743_v24 = vmax.f32 %v711_v22, 0.0  ;;  %v941_v28 = vadd.s32 80, %v4359_v59  ;;  %v943_v29 = vadd.s32 96, %v4359_v59  ;;  %v947_v36 = vadd.s32 128, %v4359_v59 }
 0x142   : > { %v761_v25 = vpack.c.bf16 %v745_v23, %v744_v19  ;;  %v949_v41 = vadd.s32 144, %v4359_v59  ;;  %v940_v45 = vadd.s32 72, %v4359_v59  ;;  %v938_v51 = vadd.s32 56, %v4359_v59 }
 0x143   : > { %v760_v26 = vpack.c.bf16 %v743_v24, %v742_v21  ;;  %v1051_v33 = vand.u32 15, %v943_v29  ;;  %v1079_v38 = vand.u32 15, %v947_v36  ;;  %v942_v2 = vadd.s32 88, %v4359_v59 }
 0x144   : > { %802 = vrot.lane.b32.xlu0 %v4218_v14, %s4059_s22  ;;  %867 = vrot.lane.b32.xlu1 %v4218_v14, %s4060_s23  ;;  %783 = vst.msk [vmem:[#allocation2 + $0x88] sm:$0xff] %vm5516_vm1, %v761_v25  ;;  %v962_v14 = vadd.s32 248, %v4359_v59  ;;  %v1093_v50 = vand.u32 15, %v949_v41  ;;  %v1030_v54 = vand.u32 15, %v940_v45  ;;  %v1016_v63 = vand.u32 15, %v938_v51 }
 0x145   : > { %782 = vst.msk [vmem:[#allocation2 + $0x80] sm:$0xff] %vm5516_vm1, %v760_v26  ;;  %vm1359_vm8 = vcmp.ne.s32.totalorder %v1051_v33, 0  ;;  %vm4391_vm14 = vcmp.ne.s32.totalorder %v1079_v38, 0  ;;  %v944_v7 = vadd.s32 104, %v4359_v59  ;;  %v946_v13 = vadd.s32 120, %v4359_v59 }
 0x146   : > { %v1184_v30 = vand.u32 15, %v962_v14  ;;  %vm1440_vm12 = vmpackc.low %vm1359_vm8, %vm1359_vm8  ;;  %vm4413_vm6 = vcmp.ne.s32.totalorder %v1030_v54, 15  ;;  %vm4426_vm8 = vcmp.ne.s32.totalorder %v1016_v63, 15  ;;  %v1044_v19 = vand.u32 15, %v942_v2 }
 0x147   : > { %v1472_v44 = vsel %vm1440_vm12, 65537, %v5517_v56  ;;  %v951_v22 = vadd.s32 160, %v4359_v59  ;;  %v967_v23 = vand.u32 15, %v4359_v59 }
 0x148   : > { %869 = vrot.lane.b32.xlu0 %v4239_v35, %s4060_s23  ;;  %830 = vrot.lane.b32.xlu1 %v761_v25, %s4059_s22  ;;  %vm4366_vm3 = vcmp.ne.s32.totalorder %v1184_v30, 15  ;;  %v3543_v52 = vcombine.low %v1472_v44, %v4382_v39  ;;  %vm4447_vm12 = vcmp.ne.s32.totalorder %v1044_v19, 15  ;;  %v4547_v19 = vadd.s32 192, %v4359_v59 }
 0x149   : > { %vm2323_vm9 = vmpackc.low %vm4366_vm3, %vm4366_vm3  ;;  %v1107_v34 = vand.u32 15, %v951_v22 }
 0x14a   : > { %v2355_v42 = vsel %vm2323_vm9, 65537, %v5517_v56  ;;  %vm1444_vm3 = vmpackc.low %vm4391_vm14, %vm4391_vm14  ;;  %v1589_v0 = vshll.u32 %v3543_v52, 16  ;;  %v1593_v18 = vshrl.u32 %v3543_v52, 16  ;;  %v935_v52 = vadd.s32 32, %v4359_v59 }
 0x14b   : > { %v4396_v48 = vcombine.low %v4382_v39, %v2355_v42  ;;  %v1476_v1 = vsel %vm1444_vm3, 65537, %v5517_v56  ;;  %vm2301_vm9 = vmpackc.low %vm4413_vm6, %vm4413_vm6  ;;  %vm913_vm6 = vcmask 97344  }
 0x14c   : > { %895 = vrot.lane.b32.xlu0 %v761_v25, %s4060_s23  ;;  %893 = vrot.lane.b32.xlu1 %v760_v26, %s4060_s23  ;;  %v3545_v11 = vcombine.low %v1476_v1, %v4382_v39  ;;  %v1591_v16 = vrot.slane %v1589_v0, 1  ;;  %v933_v25 = vadd.s32 16, %v4359_v59  ;;  %v4512_v1 = vadd.s32 176, %v4359_v59 }
 0x14d   : > { %v2524_v60 = vshrl.u32 %v4396_v48, 16 }
 0x14e   : > { %v1605_v14 = vshll.u32 %v3545_v11, 16  ;;  %v1595_v33 = vor.u32 %v1593_v18, %v1591_v16  ;;  %v981_v36 = vand.u32 15, %v933_v25 }
 0x14f   : > { %v4423_v8 = vrot.slane %v2524_v60, 7 }
 0x150   : > { %804 = vrot.lane.b32.xlu0 %v4239_v35, %s4059_s22  ;;  %828 = vrot.lane.b32.xlu1 %v760_v26, %s4059_s22  ;;  %v939_v35 = vadd.s32 64, %v4359_v59  ;;  %v1058_v26 = vand.u32 15, %v944_v7  ;;  %v1607_v42 = vrot.slane %v1605_v14, 1 }
 0x151   : > { %5531 = vst [vmem:[#allocation3_spill] sm:$0xff] %v4423_v8 }
 0x152   : > { %v1023_v31 = vand.u32 15, %v939_v35  ;;  %v2333_v35 = vsel %vm2301_vm9, 65537, %v5517_v56  ;;  %vm4458_vm14 = vcmp.ne.s32.totalorder %v1058_v26, 15  ;;  %vm4493_vm9 = vcmp.ne.s32.totalorder %v981_v36, 0 }
 0x153   : > { %v3593_v38 = vcombine.low %v4382_v39, %v2333_v35  ;;  %vm1430_vm1 = vmpackc.low %vm4493_vm9, %vm4493_vm9  ;;  %v934_v36 = vadd.s32 24, %v4359_v59 }
 0x154   : > { %871 = vrot.lane.b32.xlu0 %v4236_v32, %s4060_s23  ;;  %865 = vrot.lane.b32.xlu1 %v4221_v17, %s4060_s23  ;;  %v1037_v17 = vand.u32 15, %v941_v28  ;;  %vm1355_vm4 = vcmp.ne.s32.totalorder %v1023_v31, 0  ;;  %v1072_v28 = vand.u32 15, %v946_v13 }
 0x155   : > { %vm1436_vm10 = vmpackc.low %vm1355_vm4, %vm1355_vm4  ;;  %vm4406_vm4 = vcmp.ne.s32.totalorder %v1093_v50, 0  ;;  %v2439_v13 = vshll.u32 %v3593_v38, 16 }
 0x156   : > { %vm4370_vm5 = vcmp.ne.s32.totalorder %v1037_v17, 0  ;;  %v1468_v40 = vsel %vm1436_vm10, 65537, %v5517_v56  ;;  %vm1446_vm7 = vmpackc.low %vm4406_vm4, %vm4406_vm4  ;;  %vm1540_vm10 = vsmask.f32 7424  ;;  %v948_v17 = vadd.s32 136, %v4359_v59 }
 0x157   : > { %vm1438_vm11 = vmpackc.low %vm4370_vm5, %vm4370_vm5  ;;  %v3541_v46 = vcombine.low %v1468_v40, %v4382_v39  ;;  %vm848_vm5 = vcmask 64544   ;;  %v1478_v21 = vsel %vm1446_vm7, 65537, %v5517_v56  ;;  %vm4465_vm3 = vcmp.ne.s32.totalorder %v1072_v28, 15 }
 0x158   : > { %806 = vrot.lane.b32.xlu1 %v4236_v32, %s4059_s22  ;;  %v945_v32 = vadd.s32 112, %v4359_v59  ;;  %v1470_v43 = vsel %vm1438_vm11, 65537, %v5517_v56  ;;  %vm2299_vm11 = vmpackc.low %vm4426_vm8, %vm4426_vm8  ;;  %v4445_v30 = vcombine.low %v1478_v21, %v4382_v39  ;;  %vm4482_vm7 = vcmp.ne.s32.totalorder %v1107_v34, 0 }
 0x159   : > { %v3542_v49 = vcombine.low %v1470_v43, %v4382_v39  ;;  %v1573_v55 = vshll.u32 %v3541_v46, 16  ;;  %v1577_v6 = vshrl.u32 %v3541_v46, 16  ;;  %v1609_v43 = vshrl.u32 %v3545_v11, 16  ;;  %vm2305_vm8 = vmpackc.low %vm4458_vm14, %vm4458_vm14 }
 0x15a   : > { %v1065_v37 = vand.u32 15, %v945_v32  ;;  %v1613_v47 = vshll.u32 %v4445_v30, 16  ;;  %vm1448_vm14 = vmpackc.low %vm4482_vm7, %vm4482_vm7 }
 0x15b   : > { %v1581_v61 = vshll.u32 %v3542_v49, 16  ;;  %v4417_v5 = vrot.slane %v1573_v55, 1  ;;  %v1585_v15 = vshrl.u32 %v3542_v49, 16  ;;  %v1086_v49 = vand.u32 15, %v948_v17 }
 0x15c   : > { %873 = vrot.lane.b32.xlu1 %v4253_v53, %s4060_s23  ;;  %vm1361_vm13 = vcmp.ne.s32.totalorder %v1065_v37, 0  ;;  %v2331_v37 = vsel %vm2299_vm11, 65537, %v5517_v56  ;;  %vm2307_vm11 = vmpackc.low %vm4465_vm3, %vm4465_vm3  ;;  %v4509_v0 = vor.u32 %v1609_v43, %v1607_v42  ;;  %v4514_v2 = vrot.slane %v1613_v47, 1 }
 0x15d   : > { %vm1442_vm15 = vmpackc.low %vm1361_vm13, %vm1361_vm13  ;;  %v1583_v10 = vrot.slane %v1581_v61, 1  ;;  %v1579_v24 = vor.u32 %v1577_v6, %v4417_v5  ;;  %vm4452_vm13 = vcmp.ne.s32.totalorder %v967_v23, 0  ;;  %v4488_v54 = vcombine.low %v4382_v39, %v2331_v37 }
 0x15e   : > { %v1474_v58 = vsel %vm1442_vm15, 65537, %v5517_v56  ;;  %vm2303_vm15 = vmpackc.low %vm4447_vm12, %vm4447_vm12  ;;  %v950_v61 = vadd.s32 152, %v4359_v59  ;;  %vm1925_vm12 = vsmask.f32 256  ;;  %v995_v6 = vand.u32 15, %v935_v52 }
 0x15f   : > { %v3544_v3 = vcombine.low %v1474_v58, %v4382_v39  ;;  %v1587_v29 = vor.u32 %v1585_v15, %v1583_v10  ;;  %v4470_v45 = vsel %vm1540_vm10, %v1579_v24, %v1583_v10  ;;  %vm1428_vm4 = vmpackc.low %vm4452_vm13, %vm4452_vm13  ;;  %v2436_v58 = vshrl.u32 %v3593_v38, 16 }
 0x160   : > { %v2335_v60 = vsel %vm2303_vm15, 65537, %v5517_v56  ;;  %v1460_v27 = vsel %vm1428_vm4, 65537, %v5517_v56  ;;  %vm4526_vm15 = vcmp.ne.s32.totalorder %v1086_v49, 15  ;;  %v2428_v7 = vshrl.u32 %v4488_v54, 16 }
 0x161   : > { %v1597_v20 = vshll.u32 %v3544_v3, 16  ;;  %v1601_v57 = vshrl.u32 %v3544_v3, 16  ;;  %v4473_v46 = vsel %vm1540_vm10, %v1587_v29, %v1591_v16  ;;  %v2337_v3 = vsel %vm2305_vm8, 65537, %v5517_v56  ;;  %vm2309_vm13 = vmpackc.low %vm4526_vm15, %vm4526_vm15 }
 0x162   : > { %v2339_v10 = vsel %vm2307_vm11, 65537, %v5517_v56  ;;  %v4541_v12 = vrot.slane %v2436_v58, 7  ;;  %v1100_v15 = vand.u32 15, %v950_v61  ;;  %v952_v16 = vadd.s32 168, %v4359_v59 }
 0x163   : > { %v1599_v32 = vrot.slane %v1597_v20, 1  ;;  %v4550_v20 = vadd.s32 208, %v4359_v59  ;;  %v4553_v21 = vcombine.low %v4382_v39, %v2337_v3  ;;  %v1480_v22 = vsel %vm1448_vm14, 65537, %v5517_v56 }
 0x164   : > { %v1462_v23 = vsel %vm1430_vm1, 65537, %v5517_v56  ;;  %v4571_v24 = vcombine.low %v1460_v27, %v4382_v39  ;;  %v4574_v25 = vcombine.low %v4382_v39, %v2339_v10  ;;  %vm4576_vm3 = vcmp.ne.s32.totalorder %v995_v6, 0 }
 0x165   : > { %v1603_v41 = vor.u32 %v1601_v57, %v1599_v32  ;;  %v4480_v50 = vsel %vm1540_vm10, %v1595_v33, %v1599_v32  ;;  %v932_v57 = vadd.s32 8, %v4359_v59  ;;  %v4581_v14 = vrot.slane %v2428_v7, 7  ;;  %vm1432_vm4 = vmpackc.low %vm4576_vm3, %vm4576_vm3 }
 0x166   : > { %v2441_v31 = vor.u32 %v2439_v13, %v4541_v12  ;;  %v2341_v17 = vsel %vm2309_vm13, 65537, %v5517_v56  ;;  %vm4585_vm1 = vcmp.ne.s32.totalorder %v1100_v15, 15  ;;  %v1114_v32 = vand.u32 15, %v952_v16 }
 0x167   : > { %v4507_v63 = vsel %vm1540_vm10, %v1603_v41, %v1607_v42  ;;  %v4591_v34 = vcombine.low %v1480_v22, %v4382_v39  ;;  %v4594_v53 = vadd.s32 48, %v4359_v59  ;;  %v2452_v37 = vshrl.u32 %v4553_v21, 16  ;;  %vm2311_vm7 = vmpackc.low %vm4585_vm1, %vm4585_vm1 }
 0x168   : > { %v4600_v38 = vcombine.low %v1462_v23, %v4382_v39  ;;  %v1542_v40 = vshll.u32 %v4571_v24, 16  ;;  %v2460_v41 = vshrl.u32 %v4574_v25, 16  ;;  %v954_v42 = vadd.s32 184, %v4359_v59 }
 0x169   : > { %v1545_v43 = vshrl.u32 %v4571_v24, 16  ;;  %v4610_v49 = vcombine.low %v4382_v39, %v2341_v17  ;;  %v974_v55 = vand.u32 15, %v932_v57  ;;  %v2442_v58 = vsel %vm1925_vm12, %v4581_v14, %v2441_v31 }
 0x16a   : > { %vm4617_vm8 = vcmp.ne.s32.totalorder %v1114_v32, 15  ;;  %v956_v61 = vadd.s32 200, %v4359_v59  ;;  %v1464_v27 = vsel %vm1432_vm4, 65537, %v5517_v56  ;;  %v988_v3 = vand.u32 15, %v934_v36 }
 0x16b   : > { %v2454_v4 = vrot.slane %v2452_v37, 7  ;;  %v2455_v6 = vshll.u32 %v4553_v21, 16  ;;  %v4625_v7 = vrot.slane %v2460_v41, 7  ;;  %v2343_v10 = vsel %vm2311_vm7, 65537, %v5517_v56  ;;  %vm2313_vm11 = vmpackc.low %vm4617_vm8, %vm4617_vm8 }
 0x16c   : > { %v1549_v13 = vshll.u32 %v4600_v38, 16  ;;  %vm2535_vm9 = vcmp.ne.s16.totalorder %v2442_v58, 0  ;;  %v2468_v16 = vshrl.u32 %v4610_v49, 16  ;;  %v4634_v21 = vrot.slane %v1542_v40, 1 }
 0x16d   : > { %v1553_v24 = vshrl.u32 %v4600_v38, 16  ;;  %vm4637_vm14 = vcmp.ne.s32.totalorder %v974_v55, 15  ;;  %v1142_v26 = vand.u32 15, %v956_v61  ;;  %vm4648_vm15 = vcmp.ne.s32.totalorder %v988_v3, 15 }
 0x16e   : > { %v4653_v31 = vcombine.low %v4382_v39, %v2343_v10  ;;  %v2345_v32 = vsel %vm2313_vm11, 65537, %v5517_v56  ;;  %vm2293_vm3 = vmpackc.low %vm4637_vm14, %vm4637_vm14  ;;  %v4677_v37 = vadd.s32 40, %v4359_v59  ;;  %v4681_v41 = vrot.slane %v2468_v16, 7 }
 0x16f   : > { %v1009_v55 = vand.u32 15, %v4594_v53  ;;  %vm2295_vm1 = vmpackc.low %vm4648_vm15, %vm4648_vm15  ;;  %vm4691_vm4 = vcmp.ne.s32.totalorder %v1142_v26, 15  ;;  %v4699_v61 = vcombine.low %v4382_v39, %v2345_v32  ;;  %v958_v53 = vadd.s32 216, %v4359_v59 }
 0x170   : > { %v1002_v10 = vand.u32 15, %v4677_v37 }
 0x171   : > { %vm4752_vm15 = vcmp.ne.s32.totalorder %v1009_v55, 0 }
 0x17f   : > { %v801_v9 = vpop.permute.xlu0 %800 }
 0x180   : > { %849 = vst.msk [vmem:[#allocation2 + $0x8] sm:$0xff] %vm848_vm5, %v801_v9  ;;  %v3594_v9 = vcombine.low %v4382_v39, %v2335_v60 }
 0x182   : > { %v2444_v35 = vshrl.u32 %v3594_v9, 16  ;;  %v2447_v47 = vshll.u32 %v3594_v9, 16  ;;  %v2463_v9 = vshll.u32 %v4574_v25, 16 }
 0x184   : > { %v2446_v44 = vrot.slane %v2444_v35, 7  ;;  %v4646_v35 = vcombine.low %v1464_v27, %v4382_v39  ;;  %v2465_v33 = vor.u32 %v2463_v9, %v4625_v7  ;;  %v2327_v9 = vsel %vm2295_vm1, 65537, %v5517_v56 }
 0x186   : > { %v2449_v15 = vor.u32 %v2447_v47, %v2446_v44  ;;  %v1557_v27 = vshll.u32 %v4646_v35, 16  ;;  %v4707_v3 = vsel %vm1925_vm12, %v2454_v4, %v2465_v33 }
 0x187   : > { %vm2538_vm14 = vcmp.ne.s16.totalorder %v4707_v3, 0 }
 0x188   : > { %v2450_v40 = vsel %vm1925_vm12, %v4541_v12, %v2449_v15  ;;  %v1547_v12 = vor.u32 %v1545_v43, %v4634_v21  ;;  %v4713_v43 = vld [vmem:[%s5507_s2 + $0x10] sm:$0x3f]  }
 0x189   : > { %vm2536_vm8 = vcmp.ne.s16.totalorder %v2450_v40, 0 }
 0x18e   : > { %v811_v11 = vpop.permute.xlu0 %810  ;;  %v876_v28 = vpop.permute.xlu1 %875 }
 0x18f   : > { %854 = vst.msk [vmem:[#allocation2 + $0x30] sm:$0xff] %vm848_vm5, %v811_v11  ;;  %v1128_v11 = vand.u32 15, %v954_v42  ;;  %v2471_v42 = vshll.u32 %v4610_v49, 16 }
 0x191   : > { %vm4669_vm13 = vcmp.ne.s32.totalorder %v1128_v11, 15 }
 0x192   : > { %v809_v29 = vpop.permute.xlu0 %808  ;;  %vm2315_vm7 = vmpackc.low %vm4669_vm13, %vm4669_vm13 }
 0x193   : > { %853 = vst.msk [vmem:[#allocation2 + $0x28] sm:$0xff] %vm848_vm5, %v809_v29  ;;  %v2457_v29 = vor.u32 %v2455_v6, %v2454_v4  ;;  %v2476_v6 = vshrl.u32 %v4653_v31, 16  ;;  %v2473_v4 = vor.u32 %v2471_v42, %v4681_v41  ;;  %v960_v42 = vadd.s32 232, %v4359_v59 }
 0x194   : > { %919 = vst.msk [vmem:[#allocation2 + $0x28] sm:$0xff] %vm913_vm6, %v876_v28  ;;  %v2484_v28 = vshrl.u32 %v4699_v61, 16 }
 0x195   : > { %v2458_v49 = vsel %vm1925_vm12, %v2446_v44, %v2457_v29  ;;  %v2325_v44 = vsel %vm2293_vm3, 65537, %v5517_v56  ;;  %v1156_v29 = vand.u32 15, %v958_v53  ;;  %v2478_v36 = vrot.slane %v2476_v6, 7 }
 0x196   : > { %v880_v51 = vpop.permute.xlu0 %879  ;;  %v815_v52 = vpop.permute.xlu1 %814  ;;  %vm2537_vm11 = vcmp.ne.s16.totalorder %v2458_v49, 0  ;;  %v2474_v40 = vsel %vm1925_vm12, %v4625_v7, %v2473_v4  ;;  %v4775_v6 = vrot.slane %v2484_v28, 7  ;;  %v2487_v49 = vshll.u32 %v4699_v61, 16 }
 0x197   : > { %856 = vst.msk [vmem:[#allocation2 + $0x40] sm:$0xff] %vm848_vm5, %v815_v52  ;;  %v4684_v52 = vrot.slane %v1549_v13, 1  ;;  %vm4781_vm13 = vcmp.ne.s32.totalorder %v1156_v29, 15  ;;  %v1170_v29 = vand.u32 15, %v960_v42  ;;  %vm2539_vm3 = vcmp.ne.s16.totalorder %v2474_v40, 0 }
 0x198   : > { %vm2319_vm1 = vmpackc.low %vm4781_vm13, %vm4781_vm13 }
 0x199   : > { %v4795_v61 = vor.u32 %v1553_v24, %v4684_v52 }
 0x19a   : > { %v813_v22 = vpop.permute.xlu0 %812  ;;  %v878_v23 = vpop.permute.xlu1 %877 }
 0x19b   : > { %855 = vst.msk [vmem:[#allocation2 + $0x38] sm:$0xff] %vm848_vm5, %v813_v22  ;;  %v4643_v57 = vld [vmem:[#allocation2 + $0x28] sm:$0xff]  ;;  %v2479_v22 = vshll.u32 %v4653_v31, 16 }
 0x19c   : > { %920 = vst.msk [vmem:[#allocation2 + $0x30] sm:$0xff] %vm913_vm6, %v878_v23  ;;  %921 = vst.msk [vmem:[#allocation2 + $0x38] sm:$0xff] %vm913_vm6, %v880_v51  ;;  %3798 = vmatprep.mubr.msk.bf16.mxu1 %vm762_vm0, %v4643_v57  ;;  %v4660_v17 = vsel %vm2535_vm9, %v4643_v57, 0  ;;  %v2347_v23 = vsel %vm2315_vm7, 65537, %v5517_v56  ;;  %vm4841_vm7 = vcmp.ne.s32.totalorder %v1170_v29, 15 }
 0x19d   : > { %v2600_v58 = vshll.u32 %v4660_v17, 16  ;;  %vm2317_vm9 = vmpackc.low %vm4691_vm4, %vm4691_vm4  ;;  %v2604_v33 = vshrl.u32 %v4660_v17, 16  ;;  %v4770_v17 = vcombine.low %v4382_v39, %v2347_v23  ;;  %vm4818_vm4 = vcmp.ne.s32.totalorder %v1002_v10, 15 }
 0x19e   : > { %v884_v47 = vpop.permute.xlu0 %883  ;;  %v819_v51 = vpop.permute.xlu1 %818  ;;  %v2349_v37 = vsel %vm2317_vm9, 65537, %v5517_v56  ;;  %vm2297_vm9 = vmpackc.low %vm4818_vm4, %vm4818_vm4 }
 0x19f   : > { %858 = vst.msk [vmem:[#allocation2 + $0x50] sm:$0xff] %vm848_vm5, %v819_v51  ;;  %v4729_v16 = vrot.slane %v2600_v58, 1  ;;  %v4779_v7 = vcombine.low %v4382_v39, %v2349_v37  ;;  %v2492_v28 = vshrl.u32 %v4770_v17, 16 }
 0x1a1   : > { %5562 = vst [vmem:[#allocation4_spill] sm:$0xff] %v4729_v16  ;;  %v2606_v55 = vor.u32 %v2604_v33, %v4729_v16  ;;  %v4790_v33 = vsel %vm1540_vm10, %v1547_v12, %v4684_v52  ;;  %v2503_v29 = vshll.u32 %v4779_v7, 16 }
 0x1a2   : > { %v817_v11 = vpop.permute.xlu0 %816  ;;  %v882_v13 = vpop.permute.xlu1 %881 }
 0x1a3   : > { %v4727_v15 = vld [vmem:[#allocation2 + $0x30] sm:$0xff]  ;;  %857 = vst.msk [vmem:[#allocation2 + $0x48] sm:$0xff] %vm848_vm5, %v817_v11  ;;  %v4742_v25 = vld [vmem:[#allocation2 + $0x38] sm:$0xff] }
 0x1a4   : > { %922 = vst.msk [vmem:[#allocation2 + $0x40] sm:$0xff] %vm913_vm6, %v882_v13  ;;  %3799 = vmatmul.mubr.msk.bf16.vlgmr.msra.gmra.mrb[0].mxu1 %vm762_vm0, %v4727_v15  ;;  %v2553_v26 = vsel %vm2536_vm8, %v4727_v15, 0  ;;  %923 = vst.msk [vmem:[#allocation2 + $0x48] sm:$0xff] %vm913_vm6, %v884_v47 }
 0x1a5   : > { %3802 = vmatprep.mubr.msk.bf16.mxu1 %vm762_vm0, %v4742_v25  ;;  %3823 = vmatpush3.bf16.msra.mxu1 %v4504_v62  ;;  %v2608_v32 = vshll.u32 %v2553_v26, 16  ;;  %v2554_v62 = vsel %vm2537_vm11, %v4742_v25, 0  ;;  %v2612_v60 = vshrl.u32 %v2553_v26, 16  ;;  %v2481_v26 = vor.u32 %v2479_v22, %v2478_v36  ;;  %vm1434_vm8 = vmpackc.low %vm4752_vm15, %vm4752_vm15 }
 0x1a6   : > { %3993 = vmatprep.subr.msk.bf16.mxu1 %vm1760_vm2, %v4713_v43  ;;  %v888_v47 = vpop.permute.xlu0 %887  ;;  %v823_v51 = vpop.permute.xlu1 %822  ;;  %v2616_v53 = vshll.u32 %v2554_v62, 16  ;;  %v4804_v22 = vcombine.low %v4382_v39, %v2327_v9  ;;  %v2500_v9 = vshrl.u32 %v4779_v7, 16  ;;  %v2620_v42 = vshrl.u32 %v2554_v62, 16 }
 0x1a7   : > { %v2610_v58 = vrot.slane %v2608_v32, 1  ;;  %860 = vst.msk [vmem:[#allocation2 + $0x60] sm:$0xff] %vm848_vm5, %v823_v51  ;;  %v2482_v10 = vsel %vm1925_vm12, %v4681_v41, %v2481_v26 }
 0x1a8   : > { %v2618_v23 = vrot.slane %v2616_v53, 1  ;;  %v2494_v53 = vrot.slane %v2492_v28, 7  ;;  %v4851_v28 = vrot.slane %v2500_v9, 7  ;;  %vm2540_vm11 = vcmp.ne.s16.totalorder %v2482_v10, 0 }
 0x1a9   : > { %v4786_v11 = vsel %vm1540_vm10, %v2606_v55, %v2610_v58  ;;  %v2614_v13 = vor.u32 %v2612_v60, %v2610_v58  ;;  %v4801_v55 = vcombine.low %v4382_v39, %v2325_v44  ;;  %v2489_v44 = vor.u32 %v2487_v49, %v4775_v6 }
 0x1aa   : > { %5567 = vst [vmem:[#allocation5_spill] sm:$0xff] %v4786_v11  ;;  %v821_v32 = vpop.permute.xlu0 %820  ;;  %v886_v37 = vpop.permute.xlu1 %885  ;;  %v2495_v60 = vshll.u32 %v4770_v17, 16  ;;  %v2622_v41 = vor.u32 %v2620_v42, %v2618_v23  ;;  %v4862_v42 = vrot.slane %v1557_v27, 1  ;;  %v1466_v27 = vsel %vm1434_vm8, 65537, %v5517_v56 }
 0x1ab   : > { %v4798_v51 = vld [vmem:[#allocation2 + $0x40] sm:$0xff]  ;;  %v4807_v12 = vsel %vm1540_vm10, %v2614_v13, %v2618_v23  ;;  %859 = vst.msk [vmem:[#allocation2 + $0x58] sm:$0xff] %vm848_vm5, %v821_v32  ;;  %v4816_v38 = vld [vmem:[#allocation2 + $0x48] sm:$0xff]  ;;  %v2405_v40 = vshrl.u32 %v4801_v55, 16  ;;  %v2490_v4 = vsel %vm1925_vm12, %v2478_v36, %v2489_v44  ;;  %v2412_v36 = vshrl.u32 %v4804_v22, 16 }
 0x1ac   : > { %5568 = vst [vmem:[#allocation6_spill] sm:$0xff] %v4807_v12  ;;  %924 = vst.msk [vmem:[#allocation2 + $0x50] sm:$0xff] %vm913_vm6, %v886_v37  ;;  %3803 = vmatmul.mubr.msk.bf16.gmra.mrb[4].mxu1 %vm762_vm0, %v4798_v51  ;;  %v2555_v52 = vsel %vm2538_vm14, %v4798_v51, 0  ;;  %v2556_v3 = vsel %vm2539_vm3, %v4816_v38, 0  ;;  %v2497_v44 = vor.u32 %v2495_v60, %v2494_v53  ;;  %v2408_v60 = vshll.u32 %v4801_v55, 16 }
 0x1ad   : > { %925 = vst.msk [vmem:[#allocation2 + $0x58] sm:$0xff] %vm913_vm6, %v888_v47  ;;  %3806 = vmatprep.mubr.msk.bf16.mxu1 %vm762_vm0, %v4816_v38  ;;  %v2624_v58 = vshll.u32 %v2555_v52, 16  ;;  %v2351_v47 = vsel %vm2319_vm1, 65537, %v5517_v56  ;;  %v2628_v17 = vshrl.u32 %v2555_v52, 16  ;;  %v2632_v32 = vshll.u32 %v2556_v3, 16  ;;  %vm2321_vm14 = vmpackc.low %vm4841_vm7, %vm4841_vm7 }
 0x1ae   : > { %v892_v62 = vpop.permute.xlu0 %891  ;;  %v827_v13 = vpop.permute.xlu1 %826  ;;  %v4866_v9 = vcombine.low %v4382_v39, %v2351_v47  ;;  %vm2541_vm13 = vcmp.ne.s16.totalorder %v2490_v4, 0  ;;  %v2415_v31 = vshll.u32 %v4804_v22, 16  ;;  %v2505_v55 = vor.u32 %v2503_v29, %v4851_v28 }
 0x1af   : > { %v2626_v26 = vrot.slane %v2624_v58, 1  ;;  %862 = vst.msk [vmem:[#allocation2 + $0x70] sm:$0xff] %vm848_vm5, %v827_v13  ;;  %v2634_v52 = vrot.slane %v2632_v32, 1  ;;  %v2329_v32 = vsel %vm2297_vm9, 65537, %v5517_v56  ;;  %v2353_v22 = vsel %vm2321_vm14, 65537, %v5517_v56 }
 0x1b0   : > { %v4908_v10 = vrot.slane %v2412_v36, 7  ;;  %v2498_v29 = vsel %vm1925_vm12, %v4775_v6, %v2497_v44  ;;  %v2508_v24 = vshrl.u32 %v4866_v9, 16  ;;  %v4918_v36 = vcombine.low %v4382_v39, %v2329_v32 }
 0x1b1   : > { %v4858_v23 = vsel %vm1540_vm10, %v2622_v41, %v2626_v26  ;;  %v2630_v37 = vor.u32 %v2628_v17, %v2626_v26  ;;  %v2407_v26 = vrot.slane %v2405_v40, 7  ;;  %v2636_v40 = vshrl.u32 %v2556_v3, 16 }
 0x1b2   : > { %5573 = vst [vmem:[#allocation7_spill] sm:$0xff] %v4858_v23  ;;  %v825_v7 = vpop.permute.xlu0 %824  ;;  %v890_v58 = vpop.permute.xlu1 %889  ;;  %v2506_v4 = vsel %vm1925_vm12, %v2494_v53, %v2505_v55  ;;  %v4922_v6 = vcombine.low %v4382_v39, %v2353_v22  ;;  %vm2542_vm15 = vcmp.ne.s16.totalorder %v2498_v29, 0  ;;  %v4935_v55 = vcombine.low %v1466_v27, %v4382_v39 }
 0x1b3   : > { %v4871_v13 = vld [vmem:[#allocation2 + $0x50] sm:$0xff]  ;;  %v4881_v47 = vsel %vm1540_vm10, %v2630_v37, %v2634_v52  ;;  %861 = vst.msk [vmem:[#allocation2 + $0x68] sm:$0xff] %vm848_vm5, %v825_v7  ;;  %v2410_v49 = vor.u32 %v2408_v60, %v2407_v26  ;;  %v2511_v60 = vshll.u32 %v4866_v9, 16  ;;  %v1561_v22 = vshrl.u32 %v4646_v35, 16 }
 0x1b4   : > { %5574 = vst [vmem:[#allocation8_spill] sm:$0xff] %v4881_v47  ;;  %926 = vst.msk [vmem:[#allocation2 + $0x60] sm:$0xff] %vm913_vm6, %v890_v58  ;;  %3807 = vmatmul.mubr.msk.bf16.gmra.mrb[8].mxu1 %vm762_vm0, %v4871_v13  ;;  %v4887_v41 = vld [vmem:[#allocation2 + $0x58] sm:$0xff]  ;;  %v2557_v17 = vsel %vm2540_vm11, %v4871_v13, 0  ;;  %v2638_v58 = vor.u32 %v2636_v40, %v2634_v52  ;;  %vm2543_vm3 = vcmp.ne.s16.totalorder %v2506_v4, 0  ;;  %vm1669_vm1 = vcmp.ne.s16.totalorder %v4790_v33, 0 }
 0x1b5   : > { %927 = vst.msk [vmem:[#allocation2 + $0x68] sm:$0xff] %vm913_vm6, %v892_v62  ;;  %3810 = vmatprep.mubr.msk.bf16.mxu1 %vm762_vm0, %v4887_v41  ;;  %v2640_v37 = vshll.u32 %v2557_v17, 16  ;;  %v2558_v62 = vsel %vm2541_vm13, %v4887_v41, 0  ;;  %v2644_v47 = vshrl.u32 %v2557_v17, 16  ;;  %v1560_v9 = vsel %vm1540_vm10, %v4795_v61, %v4862_v42 }
 0x1b6   : > { %v803_v7 = vpop.permute.xlu0 %802  ;;  %v868_v3 = vpop.permute.xlu1 %867  ;;  %v2648_v23 = vshll.u32 %v2558_v62, 16  ;;  %v2420_v35 = vshrl.u32 %v4918_v36, 16  ;;  %vm2531_vm7 = vcmp.ne.s16.totalorder %v2410_v49, 0  ;;  %v2527_v61 = vshll.u32 %v4396_v48, 16 }
 0x1b7   : > { %v2642_v18 = vrot.slane %v2640_v37, 1  ;;  %850 = vst.msk [vmem:[#allocation2 + $0x10] sm:$0xff] %vm848_vm5, %v803_v7  ;;  %v2417_v37 = vor.u32 %v2415_v31, %v4908_v10  ;;  %v4929_v7 = vrot.slane %v2508_v24, 7  ;;  %v1565_v56 = vshll.u32 %v4935_v55, 16 }
 0x1b8   : > { %915 = vst.msk [vmem:[#allocation2 + $0x8] sm:$0xff] %vm913_vm6, %v868_v3  ;;  %v2650_v40 = vrot.slane %v2648_v23, 1  ;;  %v2519_v12 = vshll.u32 %v4922_v6, 16  ;;  %vm1673_vm9 = vcmp.ne.s16.totalorder %v4470_v45, 0  ;;  %vm1670_vm11 = vcmp.ne.s16.totalorder %v1560_v9, 0 }
 0x1b9   : > { %v4925_v44 = vsel %vm1540_vm10, %v2638_v58, %v2642_v18  ;;  %v2646_v52 = vor.u32 %v2644_v47, %v2642_v18  ;;  %v5577_v47 = vand.u32 15, %v4512_v1  ;;  %v2516_v58 = vshrl.u32 %v4922_v6, 16 }
 0x1ba   : > { %5575 = vst [vmem:[#allocation9_spill] sm:$0xff] %v4925_v44  ;;  %v870_v32 = vpop.permute.xlu0 %869  ;;  %v831_v3 = vpop.permute.xlu1 %830  ;;  %v2513_v1 = vor.u32 %v2511_v60, %v4929_v7 }
 0x1bb   : > { %v4932_v53 = vld [vmem:[#allocation2 + $0x60] sm:$0xff]  ;;  %v4939_v18 = vsel %vm1540_vm10, %v2646_v52, %v2650_v40  ;;  %916 = vst.msk [vmem:[#allocation2 + $0x10] sm:$0xff] %vm913_vm6, %v870_v32  ;;  %vm4956_vm4 = vcmp.ne.s32.totalorder %v5577_v47, 0  ;;  %v2418_v52 = vsel %vm1925_vm12, %v2407_v26, %v2417_v37  ;;  %v2652_v32 = vshrl.u32 %v2558_v62, 16 }
 0x1bc   : > { %5576 = vst [vmem:[#allocation10_spill] sm:$0xff] %v4939_v18  ;;  %864 = vst.msk [vmem:[#allocation2 + $0x80] sm:$0xff] %vm848_vm5, %v831_v3  ;;  %3811 = vmatmul.mubr.msk.bf16.gmra.mrb[12].mxu1 %vm762_vm0, %v4932_v53  ;;  %v4945_v23 = vld [vmem:[#allocation2 + $0x68] sm:$0xff]  ;;  %v2559_v27 = vsel %vm2542_vm15, %v4932_v53, 0  ;;  %v4976_v26 = vrot.slane %v2420_v35, 7  ;;  %v2423_v62 = vshll.u32 %v4918_v36, 16  ;;  %v2514_v49 = vsel %vm1925_vm12, %v4851_v28, %v2513_v1 }
 0x1bd   : > { %3814 = vmatprep.mubr.msk.bf16.mxu1 %vm762_vm0, %v4945_v23  ;;  %v2656_v24 = vshll.u32 %v2559_v27, 16  ;;  %v4967_v29 = vsel %vm2543_vm3, %v4945_v23, 0  ;;  %v2654_v4 = vor.u32 %v2652_v32, %v2650_v40  ;;  %vm2532_vm8 = vcmp.ne.s16.totalorder %v2418_v52, 0  ;;  %vm1450_vm13 = vmpackc.low %vm4956_vm4, %vm4956_vm4 }
 0x1be   : > { %v896_v3 = vpop.permute.xlu0 %895  ;;  %v894_v47 = vpop.permute.xlu1 %893  ;;  %v2664_v44 = vshll.u32 %v4967_v29, 16  ;;  %v2660_v37 = vshrl.u32 %v2559_v27, 16  ;;  %v2518_v60 = vrot.slane %v2516_v58, 7  ;;  %v1563_v28 = vor.u32 %v1561_v22, %v4862_v42 }
 0x1bf   : > { %v1412_v17 = vld [vmem:[#allocation2 + $0x8] sm:$0xff]  ;;  %v2658_v18 = vrot.slane %v2656_v24, 1  ;;  %928 = vst.msk [vmem:[#allocation2 + $0x70] sm:$0xff] %vm913_vm6, %v894_v47  ;;  %v2529_v24 = vor.u32 %v2527_v61, %v4423_v8  ;;  %v1567_v32 = vrot.slane %v1565_v56, 1  ;;  %v2425_v33 = vor.u32 %v2423_v62, %v4976_v26 }
 0x1c0   : > { %3790 = vmatprep.mubr.msk.bf16.mxu0 %vm762_vm0, %v1412_v17  ;;  %v2548_v48 = vsel %vm2531_vm7, %v1412_v17, 0  ;;  %v2666_v27 = vrot.slane %v2664_v44, 1  ;;  %v2521_v58 = vor.u32 %v2519_v12, %v2518_v60  ;;  %v4989_v61 = vsel %vm1669_vm1, %v1412_v17, 0 }
 0x1c1   : > { %v2571_v16 = vshll.u32 %v2548_v48, 16  ;;  %v4982_v6 = vsel %vm1540_vm10, %v2654_v4, %v2658_v18  ;;  %v2662_v40 = vor.u32 %v2660_v37, %v2658_v18  ;;  %v1569_v12 = vshrl.u32 %v4935_v55, 16 }
 0x1c2   : > { %v805_v35 = vpop.permute.xlu0 %804  ;;  %v829_v47 = vpop.permute.xlu1 %828  ;;  %v1413_v36 = vld [vmem:[#allocation2 + $0x10] sm:$0xff]  ;;  %vm2544_vm14 = vcmp.ne.s16.totalorder %v2514_v49, 0  ;;  %v2530_v44 = vsel %vm1925_vm12, %v2518_v60, %v2529_v24  ;;  %v2569_v18 = vshrl.u32 %v2548_v48, 16  ;;  %v1149_v56 = vand.u32 15, %v4550_v20 }
 0x1c3   : > { %851 = vst.msk [vmem:[#allocation2 + $0x18] sm:$0xff] %vm848_vm5, %v805_v35  ;;  %863 = vst.msk [vmem:[#allocation2 + $0x78] sm:$0xff] %vm848_vm5, %v829_v47  ;;  %3791 = vmatmul.mubr.msk.bf16.vlgmr.msra.gmra.mrb[32].mxu0 %vm762_vm0, %v1413_v36  ;;  %v4996_v1 = vsel %vm2532_vm8, %v1413_v36, 0  ;;  %v5003_v17 = vsel %vm1670_vm11, %v1413_v36, 0  ;;  %v2573_v4 = vrot.slane %v2571_v16, 1  ;;  %v1931_v22 = vshrl.u32 %v4989_v61, 16 }
 0x1c4   : > { %929 = vst.msk [vmem:[#allocation2 + $0x78] sm:$0xff] %vm913_vm6, %v896_v3  ;;  %v2576_v42 = vshll.u32 %v4996_v1, 16  ;;  %v5011_v55 = vsel %vm1540_vm10, %v2662_v40, %v2666_v27  ;;  %v2522_v9 = vsel %vm1925_vm12, %v4929_v7, %v2521_v58  ;;  %v1568_v20 = vsel %vm1540_vm10, %v1563_v28, %v1567_v32  ;;  %v5028_v35 = vld [vmem:[#allocation2 + $0x80] sm:$0xff] }
 0x1c5   : > { %v2574_v16 = vor.u32 %v2573_v4, %v2569_v18  ;;  %v1939_v7 = vshrl.u32 %v5003_v17, 16  ;;  %v1571_v60 = vor.u32 %v1569_v12, %v1567_v32  ;;  %v2426_v24 = vsel %vm1925_vm12, %v4908_v10, %v2425_v33 }
 0x1c6   : > { %v872_v52 = vpop.permute.xlu0 %871  ;;  %v866_v3 = vpop.permute.xlu1 %865  ;;  %v5008_v37 = vld [vmem:[#allocation2 + $0x70] sm:$0xff]  ;;  %v2578_v48 = vrot.slane %v2576_v42, 1  ;;  %vm2546_vm15 = vcmp.ne.s16.totalorder %v2530_v44, 0  ;;  %v2668_v36 = vshrl.u32 %v4967_v29, 16  ;;  %vm2545_vm3 = vcmp.ne.s16.totalorder %v2522_v9, 0 }
 0x1c7   : > { %917 = vst.msk [vmem:[#allocation2 + $0x18] sm:$0xff] %vm913_vm6, %v872_v52  ;;  %914 = vst.msk [vmem:[#allocation2] sm:$0xff] %vm913_vm6, %v866_v3  ;;  %3815 = vmatmul.mubr.msk.bf16.gmra.mrb[16].mxu1 %vm762_vm0, %v5008_v37  ;;  %v2561_v62 = vsel %vm2544_vm14, %v5008_v37, 0  ;;  %v5580_v58 = vmov 0   ;;  %v5581_v28 = vand.u32 15, %v4547_v19  ;;  %v5046_v32 = vrot.slane %v1931_v22, 7 }
 0x1c8   : > { %v5031_v47 = vsel %vm1540_vm10, %v2574_v16, %v2578_v48  ;;  %v2672_v40 = vshll.u32 %v2561_v62, 16  ;;  %v1482_v49 = vsel %vm1450_vm13, 65537, %v5580_v58  ;;  %vm1668_vm7 = vcmp.ne.s16.totalorder %v4634_v21, 0 }
 0x1c9   : > { %vm5042_vm1 = vcmp.ne.s32.totalorder %v5581_v28, 0  ;;  %vm1671_vm8 = vcmp.ne.s16.totalorder %v1568_v20, 0  ;;  %vm2533_vm11 = vcmp.ne.s16.totalorder %v2426_v24, 0  ;;  %v2670_v31 = vor.u32 %v2668_v36, %v2666_v27 }
 0x1ca   : > { %v807_v12 = vpop.permute.xlu1 %806  ;;  %v2674_v33 = vrot.slane %v2672_v40, 1  ;;  %vm1674_vm4 = vcmp.ne.s16.totalorder %v4473_v46, 0  ;;  %vm5053_vm14 = vcmp.ne.s32.totalorder %v1149_v56, 0  ;;  %v1934_v18 = vshll.u32 %v4989_v61, 16 }
 0x1cb   : > { %852 = vst.msk [vmem:[#allocation2 + $0x20] sm:$0xff] %vm848_vm5, %v807_v12  ;;  %v5050_v29 = vld [vmem:[#allocation2 + $0x78] sm:$0xff]  ;;  %v1941_v4 = vrot.slane %v1939_v7, 7  ;;  %v5064_v22 = vsel %vm2546_vm15, %v5028_v35, 0  ;;  %v5069_v27 = vsel %vm1673_vm9, %v4643_v57, 0  ;;  %vm1675_vm5 = vcmp.ne.s16.totalorder %v4480_v50, 0 }
 0x1cc   : > { %3818 = vmatprep.mubr.msk.bf16.mxu1 %vm762_vm0, %v5050_v29  ;;  %v2562_v42 = vsel %vm2545_vm3, %v5050_v29, 0  ;;  %v1942_v61 = vshll.u32 %v5003_v17, 16  ;;  %v1576_v56 = vsel %vm1540_vm10, %v1571_v60, %v4417_v5  ;;  %v5076_v52 = vsel %vm1540_vm10, %v2670_v31, %v2674_v33 }
 0x1cd   : > { %5586 = vst [vmem:[#allocation11_spill] sm:$0xff] %v5076_v52  ;;  %v1936_v3 = vor.u32 %v1934_v18, %v5046_v32  ;;  %v2580_v7 = vshrl.u32 %v4996_v1, 16  ;;  %v2676_v45 = vshrl.u32 %v2561_v62, 16  ;;  %v2680_v57 = vshll.u32 %v2562_v42, 16 }
 0x1ce   : > { %v874_v44 = vpop.permute.xlu1 %873  ;;  %v1414_v9 = vld [vmem:[#allocation2 + $0x18] sm:$0xff]  ;;  %v1411_v16 = vld [vmem:[#allocation2] sm:$0x80]  ;;  %v2688_v60 = vshll.u32 %v5064_v22, 16  ;;  %v1944_v1 = vor.u32 %v1942_v61, %v1941_v4  ;;  %v2684_v18 = vshrl.u32 %v2562_v42, 16  ;;  %v959_v21 = vadd.s32 224, %v4359_v59 }
 0x1cf   : > { %918 = vst.msk [vmem:[#allocation2 + $0x20] sm:$0xff] %vm913_vm6, %v874_v44  ;;  %v1688_v36 = vsel %vm1671_vm8, %v1414_v9, 0  ;;  %3794 = vmatprep.mubr.msk.bf16.mxu0 %vm762_vm0, %v1414_v9  ;;  %3819 = vmatmul.mubr.msk.bf16.gmra.mrb[20].mxu1 %vm762_vm0, %v5028_v35  ;;  %v1685_v5 = vsel %vm1668_vm7, %v1411_v16, 0  ;;  %v5088_v17 = vsel %vm2533_vm11, %v1414_v9, 0  ;;  %v2582_v20 = vor.u32 %v2580_v7, %v2578_v48  ;;  %vm1452_vm6 = vmpackc.low %vm5042_vm1, %vm5042_vm1 }
 0x1d0   : > { %v1947_v62 = vshrl.u32 %v1688_v36, 16  ;;  %v1927_v40 = vshrl.u32 %v1685_v5, 16  ;;  %v2584_v28 = vshll.u32 %v5088_v17, 16  ;;  %v2678_v12 = vor.u32 %v2676_v45, %v2674_v33 }
 0x1d1   : > { %v2682_v31 = vrot.slane %v2680_v57, 1  ;;  %v1950_v11 = vshll.u32 %v1688_v36, 16  ;;  %v5101_v9 = vrot.slane %v2688_v60, 1  ;;  %vm1672_vm9 = vcmp.ne.s16.totalorder %v1576_v56, 0 }
 0x1d2   : > { %v1949_v44 = vrot.slane %v1947_v62, 7  ;;  %v1929_v8 = vrot.slane %v1927_v40, 7  ;;  %v5092_v52 = vrot.slane %v2584_v28, 1  ;;  %v1963_v10 = vshrl.u32 %v5069_v27, 16 }
 0x1d3   : > { %v5099_v24 = vsel %vm1540_vm10, %v2678_v12, %v2682_v31  ;;  %v2686_v61 = vor.u32 %v2684_v18, %v2682_v31  ;;  %v5110_v16 = vcombine.low %v1482_v49, %v4382_v39  ;;  %v2754_v7 = vsel %vm1760_vm2, %v4713_v43, 0  ;;  %vm1454_vm2 = vmpackc.low %vm5053_vm14, %vm5053_vm14 }
 0x1d4   : > { %v1952_v48 = vor.u32 %v1950_v11, %v1949_v44  ;;  %v1937_v33 = vsel %vm1925_vm12, %v1929_v8, %v1936_v3  ;;  %v5106_v42 = vsel %vm1540_vm10, %v2582_v20, %v5092_v52  ;;  %v1617_v8 = vshrl.u32 %v4445_v30, 16 }
 0x1d5   : > { %3824 = vmatprep.mubr.msk.bf16.mxu1 %vm762_vm0, %v1937_v33  ;;  %v5117_v11 = vsel %vm1540_vm10, %v2686_v61, %v5101_v9  ;;  %v1484_v3 = vsel %vm1452_vm6, 65537, %v5580_v58  ;;  %v1945_v57 = vsel %vm1925_vm12, %v5046_v32, %v1944_v1  ;;  %v1691_v36 = vsel %vm1674_vm4, %v4727_v15, 0 }
 0x1d6   : > { %v5121_v45 = vld [vmem:[#allocation2 + $0x20] sm:$0xff]  ;;  %v1953_v49 = vsel %vm1925_vm12, %v1941_v4, %v1952_v48  ;;  %v1163_v43 = vand.u32 15, %v959_v21  ;;  %v961_v30 = vadd.s32 240, %v4359_v59  ;;  %v1692_v46 = vsel %vm1675_vm5, %v4742_v25, 0 }
 0x1d7   : > { %v1689_v5 = vsel %vm1672_vm9, %v5121_v45, 0  ;;  %3795 = vmatmul.mubr.msk.bf16.gmra.mrb[36].mxu0 %vm762_vm0, %v5121_v45  ;;  %3825 = vmatmul.mubr.msk.bf16.vlgmr.msra.gmra.mrb[24].mxu1 %vm762_vm0, %v1945_v57  ;;  %v1616_v15 = vsel %vm1540_vm10, %v4509_v0, %v4514_v2  ;;  %v1625_v32 = vshrl.u32 %v4591_v34, 16  ;;  %v1965_v59 = vrot.slane %v1963_v10, 7 }
 0x1d8   : > { %v1955_v4 = vshrl.u32 %v1689_v5, 16  ;;  %3857 = vmatpush3.bf16.msra.mxu1 %v2754_v7  ;;  %3828 = vmatprep.mubr.msk.bf16.mxu1 %vm762_vm0, %v1953_v49  ;;  %v5587_v56 = vshll.u32 %v4591_v34, 16  ;;  %v1629_v1 = vshll.u32 %v5110_v16, 16  ;;  %v3549_v62 = vcombine.low %v1484_v3, %v4382_v39 }
 0x1d9   : > { %v1971_v50 = vshrl.u32 %v1691_v36, 16  ;;  %v1486_v0 = vsel %vm1454_vm2, 65537, %v5580_v58  ;;  %v1958_v40 = vshll.u32 %v1689_v5, 16  ;;  %v1966_v28 = vshll.u32 %v5069_v27, 16 }
 0x1da   : > { %v1623_v60 = vrot.slane %v5587_v56, 1  ;;  %v1957_v25 = vrot.slane %v1955_v4, 7  ;;  %v1979_v20 = vshrl.u32 %v1692_v46, 16  ;;  %vm5157_vm13 = vcmp.ne.s32.totalorder %v1163_v43, 0 }
 0x1db   : > { %v1177_v12 = vand.u32 15, %v961_v30  ;;  %vm1676_vm15 = vcmp.ne.s16.totalorder %v4507_v63, 0  ;;  %vm1677_vm3 = vcmp.ne.s16.totalorder %v1616_v15, 0  ;;  %v1619_v31 = vor.u32 %v1617_v8, %v4514_v2  ;;  %vm1456_vm1 = vmpackc.low %vm5157_vm13, %vm5157_vm13 }
 0x1dc   : > { %v1960_v18 = vor.u32 %v1958_v40, %v1957_v25  ;;  %v1968_v21 = vor.u32 %v1966_v28, %v1965_v59  ;;  %v1627_v19 = vor.u32 %v1625_v32, %v1623_v60  ;;  %v1631_v61 = vrot.slane %v1629_v1, 1 }
 0x1dd   : > { %v1637_v48 = vshll.u32 %v3549_v62, 16  ;;  %v1973_v33 = vrot.slane %v1971_v50, 7  ;;  %v3550_v10 = vcombine.low %v1486_v0, %v4382_v39  ;;  %v1981_v7 = vrot.slane %v1979_v20, 7 }
 0x1de   : > { %v1961_v27 = vsel %vm1925_vm12, %v1949_v44, %v1960_v18  ;;  %v1693_v63 = vsel %vm1676_vm15, %v4798_v51, 0  ;;  %vm5169_vm7 = vcmp.ne.s32.totalorder %v1177_v12, 0  ;;  %v1969_v2 = vsel %vm1925_vm12, %v1957_v25, %v1968_v21 }
 0x1df   : > { %3829 = vmatmul.mubr.msk.bf16.gmra.mrb[28].mxu1 %vm762_vm0, %v1961_v27  ;;  %v1974_v8 = vshll.u32 %v1691_v36, 16  ;;  %v1694_v57 = vsel %vm1677_vm3, %v4816_v38, 0  ;;  %v1624_v49 = vsel %vm1540_vm10, %v1619_v31, %v1623_v60  ;;  %v1633_v43 = vshrl.u32 %v5110_v16, 16  ;;  %vm1458_vm8 = vmpackc.low %vm5169_vm7, %vm5169_vm7 }
 0x1e0   : > { %3832 = vmatprep.mubr.msk.bf16.mxu1 %vm762_vm0, %v1969_v2  ;;  %v1982_v44 = vshll.u32 %v1692_v46, 16  ;;  %v1632_v51 = vsel %vm1540_vm10, %v1627_v19, %v1631_v61  ;;  %v1639_v30 = vrot.slane %v1637_v48, 1  ;;  %v1488_v5 = vsel %vm1456_vm1, 65537, %v5580_v58 }
 0x1e1   : > { %v1976_v32 = vor.u32 %v1974_v8, %v1973_v33  ;;  %v1987_v4 = vshrl.u32 %v1693_v63, 16  ;;  %v1641_v56 = vshrl.u32 %v3549_v62, 16  ;;  %v1645_v1 = vshll.u32 %v3550_v10, 16 }
 0x1e2   : > { %v1984_v38 = vor.u32 %v1982_v44, %v1981_v7  ;;  %v1995_v36 = vshrl.u32 %v1694_v57, 16  ;;  %vm1678_vm11 = vcmp.ne.s16.totalorder %v1624_v49, 0  ;;  %v3551_v16 = vcombine.low %v1488_v5, %v4382_v39 }
 0x1e3   : > { %vm1679_vm4 = vcmp.ne.s16.totalorder %v1632_v51, 0  ;;  %v1635_v46 = vor.u32 %v1633_v43, %v1631_v61  ;;  %v1490_v15 = vsel %vm1458_vm8, 65537, %v5580_v58  ;;  %v1989_v60 = vrot.slane %v1987_v4, 7 }
 0x1e4   : > { %v1643_v50 = vor.u32 %v1641_v56, %v1639_v30  ;;  %v1647_v0 = vrot.slane %v1645_v1, 1  ;;  %v1977_v25 = vsel %vm1925_vm12, %v1965_v59, %v1976_v32  ;;  %v1997_v62 = vrot.slane %v1995_v36, 7 }
 0x1e5   : > { %v1695_v40 = vsel %vm1678_vm11, %v4871_v13, 0  ;;  %v1985_v28 = vsel %vm1925_vm12, %v1973_v33, %v1984_v38  ;;  %v1990_v20 = vshll.u32 %v1693_v63, 16  ;;  %v1696_v34 = vsel %vm1679_vm4, %v4887_v41, 0 }
 0x1e6   : > { %v1653_v12 = vshll.u32 %v3551_v16, 16  ;;  %v3552_v31 = vcombine.low %v1490_v15, %v4382_v39  ;;  %v1998_v58 = vshll.u32 %v1694_v57, 16  ;;  %v1640_v18 = vsel %vm1540_vm10, %v1635_v46, %v1639_v30 }
 0x1e7   : > { %3833 = vmatmul.mubr.msk.bf16.gmra.mrb[0].mxu1 %vm762_vm0, %v1977_v25  ;;  %v1649_v21 = vshrl.u32 %v3550_v10, 16  ;;  %v1992_v59 = vor.u32 %v1990_v20, %v1989_v60  ;;  %v2003_v19 = vshrl.u32 %v1695_v40, 16  ;;  %v1648_v13 = vsel %vm1540_vm10, %v1643_v50, %v1647_v0 }
 0x1e8   : > { %3836 = vmatprep.mubr.msk.bf16.mxu1 %vm762_vm0, %v1985_v28  ;;  %v1657_v61 = vshrl.u32 %v3551_v16, 16  ;;  %v2000_v48 = vor.u32 %v1998_v58, %v1997_v62  ;;  %v2011_v27 = vshrl.u32 %v1696_v34, 16  ;;  %vm1680_vm14 = vcmp.ne.s16.totalorder %v1640_v18, 0 }
 0x1e9   : > { %v1655_v33 = vrot.slane %v1653_v12, 1  ;;  %v1661_v63 = vshll.u32 %v3552_v31, 16  ;;  %vm1681_vm5 = vcmp.ne.s16.totalorder %v1648_v13, 0  ;;  %v1651_v41 = vor.u32 %v1649_v21, %v1647_v0 }
 0x1ea   : > { %v2005_v3 = vrot.slane %v2003_v19, 7  ;;  %v1993_v2 = vsel %vm1925_vm12, %v1981_v7, %v1992_v59  ;;  %v2013_v8 = vrot.slane %v2011_v27, 7  ;;  %v1697_v57 = vsel %vm1680_vm14, %v4932_v53, 0 }
 0x1eb   : > { %v1659_v39 = vor.u32 %v1657_v61, %v1655_v33  ;;  %v2001_v10 = vsel %vm1925_vm12, %v1989_v60, %v2000_v48  ;;  %v2006_v49 = vshll.u32 %v1695_v40, 16  ;;  %v1698_v43 = vsel %vm1681_vm5, %v4945_v23, 0 }
 0x1ec   : > { %v1663_v44 = vrot.slane %v1661_v63, 1  ;;  %v2014_v51 = vshll.u32 %v1696_v34, 16  ;;  %v1656_v30 = vsel %vm1540_vm10, %v1651_v41, %v1655_v33  ;;  %v2019_v32 = vshrl.u32 %v1697_v57, 16 }
 0x1ed   : > { %v2008_v5 = vor.u32 %v2006_v49, %v2005_v3  ;;  %v2027_v56 = vshrl.u32 %v1698_v43, 16  ;;  %vm1682_vm6 = vcmp.ne.s16.totalorder %v1656_v30, 0  ;;  %v1665_v1 = vshrl.u32 %v3552_v31, 16  ;;  %v5596_v49 = vld [vmem:[#allocation8_spill] sm:$0xff]  ;;  %v2291_v30 = vld [vmem:[#allocation2 + $0x88] sm:$0x1] }
 0x1ee   : > { %v1664_v7 = vsel %vm1540_vm10, %v1659_v39, %v1663_v44  ;;  %v2016_v4 = vor.u32 %v2014_v51, %v2013_v8  ;;  %v2021_v53 = vrot.slane %v2019_v32, 7  ;;  %v1699_v23 = vsel %vm1682_vm6, %v5008_v37, 0  ;;  %v5599_v51 = vld [vmem:[#allocation11_spill] sm:$0xff] }
 0x1ef   : > { %3837 = vmatmul.mubr.msk.bf16.gmra.mrb[4].mxu1 %vm762_vm0, %v1993_v2  ;;  %vm1683_vm9 = vcmp.ne.s16.totalorder %v1664_v7, 0  ;;  %v2009_v38 = vsel %vm1925_vm12, %v1997_v62, %v2008_v5  ;;  %v2029_v36 = vrot.slane %v2027_v56, 7  ;;  %v2022_v46 = vshll.u32 %v1697_v57, 16  ;;  %v5600_v5 = vld [vmem:[#allocation3_spill] sm:$0xff] }
 0x1f0   : > { %3840 = vmatprep.mubr.msk.bf16.mxu1 %vm762_vm0, %v2001_v10  ;;  %v2017_v16 = vsel %vm1925_vm12, %v2005_v3, %v2016_v4  ;;  %v1700_v15 = vsel %vm1683_vm9, %v5050_v29, 0  ;;  %v2030_v60 = vshll.u32 %v1698_v43, 16  ;;  %v2035_v0 = vshrl.u32 %v1699_v23, 16  ;;  %v5597_v43 = vld [vmem:[#allocation9_spill] sm:$0xff] }
 0x1f1   : > { %v2024_v50 = vor.u32 %v2022_v46, %v2021_v53  ;;  %v1667_v25 = vor.u32 %v1665_v1, %v1663_v44  ;;  %v2043_v28 = vshrl.u32 %v1700_v15, 16  ;;  %v2431_v37 = vshll.u32 %v4488_v54, 16  ;;  %v5598_v44 = vld [vmem:[#allocation10_spill] sm:$0xff] }
 0x1f2   : > { %v2032_v40 = vor.u32 %v2030_v60, %v2029_v36  ;;  %v2037_v20 = vrot.slane %v2035_v0, 7  ;;  %v2038_v29 = vshll.u32 %v1699_v23, 16  ;;  %v2046_v31 = vshll.u32 %v1700_v15, 16  ;;  %v5275_v60 = vld [vmem:[%s5512_s7] ss:$0 sm:$0xff] }
 0x1f3   : > { %vm1684_vm2 = vcmp.ne.s16.totalorder %v1667_v25, 0  ;;  %v2025_v62 = vsel %vm1925_vm12, %v2013_v8, %v2024_v50  ;;  %v2045_v34 = vrot.slane %v2043_v28, 7  ;;  %v2433_v21 = vor.u32 %v2431_v37, %v4581_v14  ;;  %v5592_v8 = vld [vmem:[#allocation4_spill] sm:$0xff] }
 0x1f4   : > { %v2033_v12 = vsel %vm1925_vm12, %v2021_v53, %v2032_v40  ;;  %v1701_v58 = vsel %vm1684_vm2, %v5028_v35, 0  ;;  %v2040_v18 = vor.u32 %v2038_v29, %v2037_v20  ;;  %vm2547_vm15 = vcmp.ne.s16.totalorder %v5600_v5, 0 }
 0x1f5   : > { %v2048_v59 = vor.u32 %v2046_v31, %v2045_v34  ;;  %v2051_v19 = vshrl.u32 %v1701_v58, 16  ;;  %v2434_v54 = vsel %vm1925_vm12, %v4976_v26, %v2433_v21  ;;  %v2054_v27 = vshll.u32 %v1701_v58, 16 }
 0x1f6   : > { %v2041_v13 = vsel %vm1925_vm12, %v2029_v36, %v2040_v18  ;;  %vm2534_vm13 = vcmp.ne.s16.totalorder %v2434_v54, 0  ;;  %v2588_v26 = vshrl.u32 %v5088_v17, 16  ;;  %v5594_v17 = vld [vmem:[#allocation6_spill] sm:$0xff]  ;;  %v2564_v32 = vsel %vm2547_vm15, %v2291_v30, 0 }
 0x1f7   : > { %3841 = vmatmul.mubr.msk.bf16.gmra.mrb[8].mxu1 %vm762_vm0, %v2009_v38  ;;  %v2049_v61 = vsel %vm1925_vm12, %v2037_v20, %v2048_v59  ;;  %v2053_v48 = vrot.slane %v2051_v19, 7  ;;  %v2551_v33 = vsel %vm2534_vm13, %v5121_v45, 0  ;;  %v2692_v7 = vshrl.u32 %v5064_v22, 16  ;;  %v5270_v22 = vld [vmem:[%s5511_s6] ss:$0 sm:$0xff] }
 0x1f8   : > { %3844 = vmatprep.mubr.msk.bf16.mxu1 %vm762_vm0, %v2017_v16  ;;  %v2592_v63 = vshll.u32 %v2551_v33, 16  ;;  %v2590_v3 = vor.u32 %v2588_v26, %v5092_v52  ;;  %v2596_v45 = vshrl.u32 %v2551_v33, 16  ;;  %v5595_v52 = vld [vmem:[#allocation7_spill] sm:$0xff]  ;;  %v2696_v4 = vshll.u32 %v2564_v32, 16 }
 0x1f9   : > { %v2056_v35 = vor.u32 %v2054_v27, %v2053_v48 }
 0x1fa   : > { %v2594_v41 = vrot.slane %v2592_v63, 1  ;;  %v2698_v56 = vrot.slane %v2696_v4, 1 }
 0x1fb   : > { %v2057_v14 = vsel %vm1925_vm12, %v2045_v34, %v2056_v35  ;;  %vm3124_vm12 = vcmask 1041408  }
 0x1fc   : > { %v2595_v39 = vsel %vm1540_vm10, %v2590_v3, %v2594_v41  ;;  %v2598_v2 = vor.u32 %v2596_v45, %v2594_v41 }
 0x1fe   : > { %v2603_v57 = vsel %vm1540_vm10, %v2598_v2, %v5592_v8 }
 0x1ff   : > { %3845 = vmatmul.mubr.msk.bf16.gmra.mrb[12].mxu1 %vm762_vm0, %v2025_v62 }
 0x200   : > { %3848 = vmatprep.mubr.msk.bf16.mxu1 %vm762_vm0, %v2033_v12 }
 0x207   : > { %3849 = vmatmul.mubr.msk.bf16.gmra.mrb[16].mxu1 %vm762_vm0, %v2041_v13 }
 0x208   : > { %3852 = vmatprep.mubr.msk.bf16.mxu1 %vm762_vm0, %v2049_v61 }
 0x20f   : > { %3853 = vmatmul.mubr.msk.bf16.gmra.mrb[20].mxu1 %vm762_vm0, %v2057_v14 }
 0x210   : > { %3858 = vmatprep.mubr.msk.bf16.mxu1 %vm762_vm0, %v5031_v47  ;;  %v5593_v47 = vld [vmem:[#allocation5_spill] sm:$0xff] }
 0x217   : > { %3859 = vmatmul.mubr.msk.bf16.vlgmr.msra.gmra.mrb[24].mxu1 %vm762_vm0, %v5106_v42  ;;  %v3075_v42 = vld [vmem:[%s5508_s3] sm:$0x3] }
 0x218   : > { %3862 = vmatprep.mubr.msk.bf16.mxu1 %vm762_vm0, %v2595_v39  ;;  %3994 = vmatprep.subr.msk.bf16.mxu0 %vm3124_vm12, %v3075_v42  ;;  %v3126_v10 = vsel %vm3124_vm12, %v3075_v42, 0 }
 0x219   : > { %3891 = vmatpush3.bf16.msra.mxu0 %v3126_v10 }
 0x21f   : > { %3863 = vmatmul.mubr.msk.bf16.gmra.mrb[28].mxu1 %vm762_vm0, %v2603_v57 }
 0x220   : > { %3866 = vmatprep.mubr.msk.bf16.mxu1 %vm762_vm0, %v5593_v47 }
 0x227   : > { %3867 = vmatmul.mubr.msk.bf16.gmra.mrb[0].mxu1 %vm762_vm0, %v5594_v17 }
 0x228   : > { %3870 = vmatprep.mubr.msk.bf16.mxu1 %vm762_vm0, %v5595_v52 }
 0x22f   : > { %3871 = vmatmul.mubr.msk.bf16.gmra.mrb[4].mxu1 %vm762_vm0, %v5596_v49 }
 0x230   : > { %3874 = vmatprep.mubr.msk.bf16.mxu1 %vm762_vm0, %v5597_v43 }
 0x237   : > { %3875 = vmatmul.mubr.msk.bf16.gmra.mrb[8].mxu1 %vm762_vm0, %v5598_v44 }
 0x238   : > { %3878 = vmatprep.mubr.msk.bf16.mxu1 %vm762_vm0, %v4982_v6  ;;  %v2694_v6 = vor.u32 %v2692_v7, %v5101_v9 }
 0x23f   : > { %3879 = vmatmul.mubr.msk.bf16.gmra.mrb[12].mxu1 %vm762_vm0, %v5011_v55  ;;  %v2699_v55 = vsel %vm1540_vm10, %v2694_v6, %v2698_v56 }
 0x240   : > { %3882 = vmatprep.mubr.msk.bf16.mxu1 %vm762_vm0, %v5599_v51 }
 0x247   : > { %3883 = vmatmul.mubr.msk.bf16.gmra.mrb[16].mxu1 %vm762_vm0, %v5099_v24 }
 0x248   : > { %3886 = vmatprep.mubr.msk.bf16.mxu1 %vm762_vm0, %v5117_v11 }
 0x24f   : > { %3887 = vmatmul.mubr.msk.bf16.gmra.mrb[20].mxu1 %vm762_vm0, %v2699_v55  ;;  %vm5601_vm0 = vcmask 31744  }
 0x250   : > { %vm5602_vm10 = vmmov %vm5601_vm0 }
 0x251   : > { %vm5603_vm3 = vmmov %vm5601_vm0 }
 0x252   : > { %vm5604_vm1 = vmmov %vm5601_vm0 }
 0x253   : > { %vm5605_vm7 = vmmov %vm5601_vm0 }
 0x254   : > { %vm5606_vm8 = vmmov %vm5601_vm0 }
 0x255   : > { %vm5607_vm11 = vmmov %vm5601_vm0 }
 0x256   : > { %vm5608_vm4 = vmmov %vm5601_vm0 }
 0x257   : > { %vm5609_vm14 = vmmov %vm5601_vm0 }
 0x258   : > { %vm5610_vm5 = vmmov %vm5601_vm0 }
 0x259   : > { %vm5611_vm6 = vmmov %vm5601_vm0 }
 0x25a   : > { %vm5612_vm9 = vmmov %vm5601_vm0 }
 0x25b   : > { %vm5613_vm2 = vmmov %vm5601_vm0 }
 0x25c   : > { %vm5614_vm13 = vmmov %vm5601_vm0 }
 0x25d   : > { %vm5615_vm12 = vmmov %vm5601_vm0 }
 0x25e   : > { %vm5616_vm15 = vmmov %vm5601_vm0 }
 0x296   : > { %v3792_v53 = vpop.f32.mrb[32].mxu0 }
 0x297   : > { %v1798_v1 = vpop.f32.mrb[33].mxu0 }
 0x298   : > { %v3793_v38 = vpop.f32.mrb[34].mxu0 }
 0x299   : > { %v1801_v36 = vpop.f32.mrb[35].mxu0 }
 0x2aa   : > { %v3796_v23 = vpop.f32.mrb[36].mxu0 }
 0x2ab   : > { %v1814_v16 = vpop.f32.mrb[37].mxu0 }
 0x2ac   : > { %v3797_v24 = vpop.f32.mrb[38].mxu0 }
 0x2ad   : > { %v1817_v46 = vpop.f32.mrb[39].mxu0 }
 0x2ea   : > { %v3860_v15 = vpop.f32.mrb[24].mxu1 }
 0x2eb   : > { %v3926_v9 = vadd.f32 %v3860_v15, %v3792_v53  ;;  %v2790_v11 = vpop.f32.mrb[25].mxu1 }
 0x2ec   : > { %v3927_v50 = vadd.f32 %v2790_v11, %v1798_v1  ;;  %v3861_v0 = vpop.f32.mrb[26].mxu1 }
 0x2ed   : > { %v2958_v25 = vmul.f32 %v3926_v9, %v5270_v22  ;;  %v3928_v40 = vadd.f32 %v3861_v0, %v3793_v38  ;;  %v2793_v28 = vpop.f32.mrb[27].mxu1 }
 0x2ee   : > { %v2956_v20 = vmul.f32 %v3927_v50, %v5270_v22  ;;  %v3929_v62 = vadd.f32 %v2793_v28, %v1801_v36 }
 0x2ef   : > { %v2997_v37 = vadd.f32 %v5275_v60, %v2958_v25  ;;  %v2959_v34 = vmul.f32 %v3928_v40, %v5270_v22 }
 0x2f0   : > { %v2995_v12 = vadd.f32 %v5275_v60, %v2956_v20  ;;  %v2957_v29 = vmul.f32 %v3929_v62, %v5270_v22 }
 0x2f1   : > { %v2998_v31 = vadd.f32 %v5275_v60, %v2959_v34  ;;  %v3029_v21 = vmax.f32 %v2997_v37, 0.0 }
 0x2f2   : > { %v2996_v58 = vadd.f32 %v5275_v60, %v2957_v29  ;;  %v3864_v18 = vpop.f32.mrb[28].mxu1  ;;  %v3027_v54 = vmax.f32 %v2995_v12, 0.0 }
 0x2f3   : > { %v3030_v59 = vmax.f32 %v2998_v31, 0.0  ;;  %v3930_v19 = vadd.f32 %v3864_v18, %v3796_v23  ;;  %v2806_v13 = vpop.f32.mrb[29].mxu1 }
 0x2f4   : > { %v3028_v61 = vmax.f32 %v2996_v58, 0.0  ;;  %v3931_v48 = vadd.f32 %v2806_v13, %v1814_v16  ;;  %v3865_v27 = vpop.f32.mrb[30].mxu1 }
 0x2f5   : > { %v3060_v35 = vpack.c.bf16 %v3030_v59, %v3029_v21  ;;  %v2962_v33 = vmul.f32 %v3930_v19, %v5270_v22  ;;  %v3932_v14 = vadd.f32 %v3865_v27, %v3797_v24  ;;  %v2809_v63 = vpop.f32.mrb[31].mxu1 }
 0x2f6   : > { %v3059_v26 = vpack.c.bf16 %v3028_v61, %v3027_v54  ;;  %v2960_v41 = vmul.f32 %v3931_v48, %v5270_v22  ;;  %v3933_v3 = vadd.f32 %v2809_v63, %v1817_v46 }
 0x2f7   : > { %v3001_v39 = vadd.f32 %v5275_v60, %v2962_v33  ;;  %v2963_v45 = vmul.f32 %v3932_v14, %v5270_v22 }
 0x2f8   : > { %v2999_v2 = vadd.f32 %v5275_v60, %v2960_v41  ;;  %v2961_v8 = vmul.f32 %v3933_v3, %v5270_v22  ;;  %3892 = vmatprep.mubr.msk.bf16.mxu0 %vm5601_vm0, %v3059_v26 }
 0x2f9   : > { %v3002_v57 = vadd.f32 %v5275_v60, %v2963_v45  ;;  %3893 = vmatmul.mubr.msk.bf16.vlgmr.msra.gmra.mrb[40].mxu0 %vm5602_vm10, %v3060_v35  ;;  %v3033_v52 = vmax.f32 %v3001_v39, 0.0 }
 0x2fa   : > { %v3000_v47 = vadd.f32 %v5275_v60, %v2961_v8  ;;  %v3868_v17 = vpop.f32.mrb[0].mxu1  ;;  %v3031_v43 = vmax.f32 %v2999_v2, 0.0 }
 0x2fb   : > { %v3034_v42 = vmax.f32 %v3002_v57, 0.0  ;;  %v2966_v10 = vmul.f32 %v3868_v17, %v5270_v22  ;;  %v2822_v49 = vpop.f32.mrb[1].mxu1 }
 0x2fc   : > { %v3032_v44 = vmax.f32 %v3000_v47, 0.0  ;;  %v2964_v51 = vmul.f32 %v5270_v22, %v2822_v49  ;;  %v3869_v30 = vpop.f32.mrb[2].mxu1 }
 0x2fd   : > { %v3062_v5 = vpack.c.bf16 %v3034_v42, %v3033_v52  ;;  %v3005_v32 = vadd.f32 %v5275_v60, %v2966_v10  ;;  %v2967_v7 = vmul.f32 %v3869_v30, %v5270_v22  ;;  %v2825_v4 = vpop.f32.mrb[3].mxu1 }
 0x2fe   : > { %v3061_v6 = vpack.c.bf16 %v3032_v44, %v3031_v43  ;;  %v3003_v56 = vadd.f32 %v5275_v60, %v2964_v51  ;;  %v2965_v55 = vmul.f32 %v5270_v22, %v2825_v4 }
 0x2ff   : > { %v3006_v53 = vadd.f32 %v5275_v60, %v2967_v7  ;;  %v3037_v38 = vmax.f32 %v3005_v32, 0.0 }
 0x300   : > { %v3004_v1 = vadd.f32 %v5275_v60, %v2965_v55  ;;  %3896 = vmatprep.mubr.msk.bf16.mxu0 %vm5603_vm3, %v3061_v6  ;;  %v3035_v23 = vmax.f32 %v3003_v56, 0.0 }
 0x301   : > { %v3038_v36 = vmax.f32 %v3006_v53, 0.0  ;;  %3897 = vmatmul.mubr.msk.bf16.gmra.mrb[44].mxu0 %vm5604_vm1, %v3062_v5 }
 0x302   : > { %v3036_v16 = vmax.f32 %v3004_v1, 0.0  ;;  %v3872_v24 = vpop.f32.mrb[4].mxu1 }
 0x303   : > { %v3064_v46 = vpack.c.bf16 %v3038_v36, %v3037_v38  ;;  %v2970_v15 = vmul.f32 %v3872_v24, %v5270_v22  ;;  %v2838_v9 = vpop.f32.mrb[5].mxu1 }
 0x304   : > { %v3063_v11 = vpack.c.bf16 %v3036_v16, %v3035_v23  ;;  %v2968_v50 = vmul.f32 %v5270_v22, %v2838_v9  ;;  %v3873_v0 = vpop.f32.mrb[6].mxu1 }
 0x305   : > { %v3009_v25 = vadd.f32 %v5275_v60, %v2970_v15  ;;  %v2971_v40 = vmul.f32 %v3873_v0, %v5270_v22  ;;  %v2841_v28 = vpop.f32.mrb[7].mxu1 }
 0x306   : > { %v3007_v20 = vadd.f32 %v5275_v60, %v2968_v50  ;;  %v2969_v62 = vmul.f32 %v5270_v22, %v2841_v28  ;;  %3900 = vmatprep.mubr.msk.bf16.mxu0 %vm5605_vm7, %v3063_v11 }
 0x307   : > { %v3010_v37 = vadd.f32 %v5275_v60, %v2971_v40  ;;  %v3041_v12 = vmax.f32 %v3009_v25, 0.0 }
 0x308   : > { %v3008_v34 = vadd.f32 %v5275_v60, %v2969_v62  ;;  %v3039_v31 = vmax.f32 %v3007_v20, 0.0 }
 0x309   : > { %v3042_v29 = vmax.f32 %v3010_v37, 0.0  ;;  %3901 = vmatmul.mubr.msk.bf16.gmra.mrb[48].mxu0 %vm5606_vm8, %v3064_v46 }
 0x30a   : > { %v3040_v58 = vmax.f32 %v3008_v34, 0.0  ;;  %v3876_v18 = vpop.f32.mrb[8].mxu1 }
 0x30b   : > { %v3066_v21 = vpack.c.bf16 %v3042_v29, %v3041_v12  ;;  %v2974_v59 = vmul.f32 %v3876_v18, %v5270_v22  ;;  %v2854_v19 = vpop.f32.mrb[9].mxu1 }
 0x30c   : > { %v3065_v13 = vpack.c.bf16 %v3040_v58, %v3039_v31  ;;  %v2972_v54 = vmul.f32 %v5270_v22, %v2854_v19  ;;  %v3877_v61 = vpop.f32.mrb[10].mxu1 }
 0x30d   : > { %v3013_v48 = vadd.f32 %v5275_v60, %v2974_v59  ;;  %v2975_v27 = vmul.f32 %v3877_v61, %v5270_v22  ;;  %v2857_v35 = vpop.f32.mrb[11].mxu1 }
 0x30e   : > { %v3011_v33 = vadd.f32 %v5275_v60, %v2972_v54  ;;  %v2973_v14 = vmul.f32 %v5270_v22, %v2857_v35  ;;  %3904 = vmatprep.mubr.msk.bf16.mxu0 %vm5607_vm11, %v3065_v13 }
 0x30f   : > { %v3014_v63 = vadd.f32 %v5275_v60, %v2975_v27  ;;  %v3045_v41 = vmax.f32 %v3013_v48, 0.0 }
 0x310   : > { %v3012_v26 = vadd.f32 %v5275_v60, %v2973_v14  ;;  %v3043_v39 = vmax.f32 %v3011_v33, 0.0 }
 0x311   : > { %v3046_v3 = vmax.f32 %v3014_v63, 0.0  ;;  %3905 = vmatmul.mubr.msk.bf16.gmra.mrb[52].mxu0 %vm5608_vm4, %v3066_v21  ;;  %v5365_v63 = vld [vmem:[%s5514_s9] ss:$0 sm:$0xff] }
 0x312   : > { %v3044_v45 = vmax.f32 %v3012_v26, 0.0  ;;  %v3880_v2 = vpop.f32.mrb[12].mxu1 }
 0x313   : > { %v3068_v8 = vpack.c.bf16 %v3046_v3, %v3045_v41  ;;  %v2978_v57 = vmul.f32 %v3880_v2, %v5270_v22  ;;  %v2870_v47 = vpop.f32.mrb[13].mxu1 }
 0x314   : > { %v3067_v17 = vpack.c.bf16 %v3044_v45, %v3043_v39  ;;  %v2976_v52 = vmul.f32 %v5270_v22, %v2870_v47  ;;  %v3881_v42 = vpop.f32.mrb[14].mxu1 }
 0x315   : > { %v3017_v10 = vadd.f32 %v5275_v60, %v2978_v57  ;;  %v2979_v49 = vmul.f32 %v3881_v42, %v5270_v22  ;;  %v2873_v43 = vpop.f32.mrb[15].mxu1 }
 0x316   : > { %v3015_v44 = vadd.f32 %v5275_v60, %v2976_v52  ;;  %v2977_v51 = vmul.f32 %v5270_v22, %v2873_v43  ;;  %3908 = vmatprep.mubr.msk.bf16.mxu0 %vm5609_vm14, %v3067_v17  ;;  %v4018_v17 = vld [vmem:[%s4142_s24 + $0x10] sm:$0xff] }
 0x317   : > { %v3018_v30 = vadd.f32 %v5275_v60, %v2979_v49  ;;  %v3049_v32 = vmax.f32 %v3017_v10, 0.0  ;;  %v4019_v10 = vld [vmem:[%s4142_s24] sm:$0xff] }
 0x318   : > { %v3016_v5 = vadd.f32 %v5275_v60, %v2977_v51  ;;  %v3047_v4 = vmax.f32 %v3015_v44, 0.0  ;;  %v4020_v51 = vld [vmem:[%s4142_s24 + $0x18] sm:$0xff] }
 0x319   : > { %v3050_v7 = vmax.f32 %v3018_v30, 0.0  ;;  %3909 = vmatmul.mubr.msk.bf16.gmra.mrb[56].mxu0 %vm5610_vm5, %v3068_v8 }
 0x31a   : > { %v3048_v6 = vmax.f32 %v3016_v5, 0.0  ;;  %v3884_v56 = vpop.f32.mrb[16].mxu1 }
 0x31b   : > { %v3070_v55 = vpack.c.bf16 %v3050_v7, %v3049_v32  ;;  %v2982_v53 = vmul.f32 %v3884_v56, %v5270_v22  ;;  %v2886_v1 = vpop.f32.mrb[17].mxu1  ;;  %v4021_v32 = vld [vmem:[%s4142_s24 + $0x8] sm:$0xff] }
 0x31c   : > { %v3069_v38 = vpack.c.bf16 %v3048_v6, %v3047_v4  ;;  %v2980_v36 = vmul.f32 %v5270_v22, %v2886_v1  ;;  %v3885_v23 = vpop.f32.mrb[18].mxu1 }
 0x31d   : > { %v3021_v16 = vadd.f32 %v5275_v60, %v2982_v53  ;;  %v2983_v24 = vmul.f32 %v3885_v23, %v5270_v22  ;;  %v2889_v46 = vpop.f32.mrb[19].mxu1 }
 0x31e   : > { %v3019_v15 = vadd.f32 %v5275_v60, %v2980_v36  ;;  %v2981_v9 = vmul.f32 %v5270_v22, %v2889_v46  ;;  %3912 = vmatprep.mubr.msk.bf16.mxu0 %vm5611_vm6, %v3069_v38 }
 0x31f   : > { %v3022_v11 = vadd.f32 %v5275_v60, %v2983_v24  ;;  %v3053_v0 = vmax.f32 %v3021_v16, 0.0 }
 0x320   : > { %v3020_v50 = vadd.f32 %v5275_v60, %v2981_v9  ;;  %v3051_v40 = vmax.f32 %v3019_v15, 0.0  ;;  %v4022_v15 = vld [vmem:[%s4142_s24 + $0x30] sm:$0xff] }
 0x321   : > { %v3054_v25 = vmax.f32 %v3022_v11, 0.0  ;;  %3913 = vmatmul.mubr.msk.bf16.gmra.mrb[60].mxu0 %vm5612_vm9, %v3070_v55 }
 0x322   : > { %v3052_v28 = vmax.f32 %v3020_v50, 0.0  ;;  %v3888_v20 = vpop.f32.mrb[20].mxu1  ;;  %v4023_v50 = vld [vmem:[%s4142_s24 + $0x20] sm:$0xff] }
 0x323   : > { %v3072_v62 = vpack.c.bf16 %v3054_v25, %v3053_v0  ;;  %v2986_v37 = vmul.f32 %v3888_v20, %v5270_v22  ;;  %v2902_v34 = vpop.f32.mrb[21].mxu1 }
 0x324   : > { %v3071_v12 = vpack.c.bf16 %v3052_v28, %v3051_v40  ;;  %v2984_v29 = vmul.f32 %v5270_v22, %v2902_v34  ;;  %v3889_v31 = vpop.f32.mrb[22].mxu1  ;;  %v4024_v28 = vld [vmem:[%s4142_s24 + $0x38] sm:$0xff] }
 0x325   : > { %v3025_v58 = vadd.f32 %v5275_v60, %v2986_v37  ;;  %v2987_v18 = vmul.f32 %v3889_v31, %v5270_v22  ;;  %v2905_v21 = vpop.f32.mrb[23].mxu1  ;;  %v4025_v37 = vld [vmem:[%s4142_s24 + $0x28] sm:$0xff] }
 0x326   : > { %v3023_v59 = vadd.f32 %v5275_v60, %v2984_v29  ;;  %v2985_v19 = vmul.f32 %v5270_v22, %v2905_v21  ;;  %3916 = vmatprep.mubr.msk.bf16.mxu0 %vm5613_vm2, %v3071_v12  ;;  %v5360_v22 = vld [vmem:[%s5513_s8] ss:$0 sm:$0xff] }
 0x327   : > { %v3026_v13 = vadd.f32 %v5275_v60, %v2987_v18  ;;  %v3057_v61 = vmax.f32 %v3025_v58, 0.0 }
 0x328   : > { %v3024_v54 = vadd.f32 %v5275_v60, %v2985_v19  ;;  %v3055_v27 = vmax.f32 %v3023_v59, 0.0 }
 0x329   : > { %v3058_v48 = vmax.f32 %v3026_v13, 0.0  ;;  %3917 = vmatmul.mubr.msk.bf16.gmra.mrb[64].mxu0 %vm5614_vm13, %v3072_v62 }
 0x32a   : > { %v3056_v35 = vmax.f32 %v3024_v54, 0.0 }
 0x32b   : > { %v3074_v33 = vpack.c.bf16 %v3058_v48, %v3057_v61 }
 0x32c   : > { %v3073_v14 = vpack.c.bf16 %v3056_v35, %v3055_v27  ;;  %v4026_v27 = vld [vmem:[%s4142_s24 + $0x50] sm:$0xff] }
 0x32e   : > { %3920 = vmatprep.mubr.msk.bf16.mxu0 %vm5615_vm12, %v3073_v14  ;;  %v4027_v14 = vld [vmem:[%s4142_s24 + $0x40] sm:$0xff] }
 0x331   : > { %3921 = vmatmul.mubr.msk.bf16.gmra.mrb[68].mxu0 %vm5616_vm15, %v3074_v33 }
 0x3cc   : > { %v3894_v60 = vpop.f32.mrb[40].mxu0 }
 0x3cd   : > { %v3298_v26 = vmul.f32 %v3894_v60, %v5360_v22  ;;  %v3162_v41 = vpop.f32.mrb[41].mxu0 }
 0x3ce   : > { %v3296_v3 = vmul.f32 %v5360_v22, %v3162_v41  ;;  %v3895_v39 = vpop.f32.mrb[42].mxu0 }
 0x3cf   : > { %v3337_v45 = vadd.f32 %v5365_v63, %v3298_v26  ;;  %v3299_v2 = vmul.f32 %v3895_v39, %v5360_v22  ;;  %v3165_v8 = vpop.f32.mrb[43].mxu0 }
 0x3d0   : > { %v3335_v57 = vadd.f32 %v5365_v63, %v3296_v3  ;;  %v3297_v47 = vmul.f32 %v5360_v22, %v3165_v8  ;;  %v4028_v3 = vld [vmem:[%s4142_s24 + $0x58] sm:$0xff] }
 0x3d1   : > { %v3369_v52 = vadd.f32 %v4018_v17, %v3337_v45  ;;  %v3338_v42 = vadd.f32 %v5365_v63, %v3299_v2  ;;  %v4029_v2 = vld [vmem:[%s4142_s24 + $0x48] sm:$0xff] }
 0x3d2   : > { %v3367_v49 = vadd.f32 %v4019_v10, %v3335_v57  ;;  %v3336_v43 = vadd.f32 %v5365_v63, %v3297_v47 }
 0x3d3   : > { %v3401_v44 = vmax.f32 %v3369_v52, 0.0  ;;  %v3370_v30 = vadd.f32 %v4020_v51, %v3338_v42 }
 0x3d4   : > { %v3399_v5 = vmax.f32 %v3367_v49, 0.0  ;;  %v3368_v7 = vadd.f32 %v4021_v32, %v3336_v43  ;;  %v3898_v4 = vpop.f32.mrb[44].mxu0  ;;  %v4030_v32 = vld [vmem:[%s4142_s24 + $0x70] sm:$0xff] }
 0x3d5   : > { %3433 = vst [vmem:[%s5380_s27 + $0x10] sm:$0xff] %v3401_v44  ;;  %v3402_v6 = vmax.f32 %v3370_v30, 0.0  ;;  %v3302_v56 = vmul.f32 %v3898_v4, %v5360_v22  ;;  %v3178_v55 = vpop.f32.mrb[45].mxu0 }
 0x3d6   : > { %3431 = vst [vmem:[%s5380_s27] sm:$0xff] %v3399_v5  ;;  %v3400_v53 = vmax.f32 %v3368_v7, 0.0  ;;  %v3300_v1 = vmul.f32 %v5360_v22, %v3178_v55  ;;  %v3899_v38 = vpop.f32.mrb[46].mxu0 }
 0x3d7   : > { %3434 = vst [vmem:[%s5380_s27 + $0x18] sm:$0xff] %v3402_v6  ;;  %v3341_v36 = vadd.f32 %v5365_v63, %v3302_v56  ;;  %v3303_v23 = vmul.f32 %v3899_v38, %v5360_v22  ;;  %v3181_v16 = vpop.f32.mrb[47].mxu0  ;;  %v4031_v6 = vld [vmem:[%s4142_s24 + $0x60] sm:$0xff] }
 0x3d8   : > { %3432 = vst [vmem:[%s5380_s27 + $0x8] sm:$0xff] %v3400_v53  ;;  %v3339_v24 = vadd.f32 %v5365_v63, %v3300_v1  ;;  %v3301_v46 = vmul.f32 %v5360_v22, %v3181_v16  ;;  %v4032_v1 = vld [vmem:[%s4142_s24 + $0x78] sm:$0xff] }
 0x3d9   : > { %v3373_v9 = vadd.f32 %v4022_v15, %v3341_v36  ;;  %v3342_v11 = vadd.f32 %v5365_v63, %v3303_v23  ;;  %v4033_v23 = vld [vmem:[%s4142_s24 + $0x68] sm:$0xff] }
 0x3da   : > { %v3371_v0 = vadd.f32 %v4023_v50, %v3339_v24  ;;  %v3340_v25 = vadd.f32 %v5365_v63, %v3301_v46 }
 0x3db   : > { %v3405_v40 = vmax.f32 %v3373_v9, 0.0  ;;  %v3374_v20 = vadd.f32 %v4024_v28, %v3342_v11 }
 0x3dc   : > { %v3403_v62 = vmax.f32 %v3371_v0, 0.0  ;;  %v3372_v34 = vadd.f32 %v4025_v37, %v3340_v25  ;;  %v3902_v12 = vpop.f32.mrb[48].mxu0  ;;  %v4034_v37 = vld [vmem:[%s4142_s24 + $0x90] sm:$0xff] }
 0x3dd   : > { %3437 = vst [vmem:[%s5380_s27 + $0x30] sm:$0xff] %v3405_v40  ;;  %v3406_v29 = vmax.f32 %v3374_v20, 0.0  ;;  %v3306_v31 = vmul.f32 %v3902_v12, %v5360_v22  ;;  %v3194_v58 = vpop.f32.mrb[49].mxu0 }
 0x3de   : > { %3435 = vst [vmem:[%s5380_s27 + $0x20] sm:$0xff] %v3403_v62  ;;  %v3404_v18 = vmax.f32 %v3372_v34, 0.0  ;;  %v3304_v21 = vmul.f32 %v5360_v22, %v3194_v58  ;;  %v3903_v59 = vpop.f32.mrb[50].mxu0 }
 0x3df   : > { %3438 = vst [vmem:[%s5380_s27 + $0x38] sm:$0xff] %v3406_v29  ;;  %v3345_v19 = vadd.f32 %v5365_v63, %v3306_v31  ;;  %v3307_v13 = vmul.f32 %v3903_v59, %v5360_v22  ;;  %v3197_v54 = vpop.f32.mrb[51].mxu0  ;;  %v4035_v29 = vld [vmem:[%s4142_s24 + $0x80] sm:$0xff] }
 0x3e0   : > { %3436 = vst [vmem:[%s5380_s27 + $0x28] sm:$0xff] %v3404_v18  ;;  %v3343_v61 = vadd.f32 %v5365_v63, %v3304_v21  ;;  %v3305_v48 = vmul.f32 %v5360_v22, %v3197_v54  ;;  %v4036_v21 = vld [vmem:[%s4142_s24 + $0x98] sm:$0xff] }
 0x3e1   : > { %v3377_v35 = vadd.f32 %v4026_v27, %v3345_v19  ;;  %v3346_v33 = vadd.f32 %v5365_v63, %v3307_v13  ;;  %v4037_v13 = vld [vmem:[%s4142_s24 + $0x88] sm:$0xff] }
 0x3e2   : > { %v3375_v60 = vadd.f32 %v4027_v14, %v3343_v61  ;;  %v3344_v26 = vadd.f32 %v5365_v63, %v3305_v48 }
 0x3e3   : > { %v3409_v41 = vmax.f32 %v3377_v35, 0.0  ;;  %v3378_v39 = vadd.f32 %v4028_v3, %v3346_v33 }
 0x3e4   : > { %v3407_v45 = vmax.f32 %v3375_v60, 0.0  ;;  %v3376_v8 = vadd.f32 %v4029_v2, %v3344_v26  ;;  %v3906_v57 = vpop.f32.mrb[52].mxu0  ;;  %v4038_v2 = vld [vmem:[%s4142_s24 + $0xb0] sm:$0xff] }
 0x3e5   : > { %3441 = vst [vmem:[%s5380_s27 + $0x50] sm:$0xff] %v3409_v41  ;;  %v3410_v47 = vmax.f32 %v3378_v39, 0.0  ;;  %v3310_v17 = vmul.f32 %v3906_v57, %v5360_v22  ;;  %v3210_v52 = vpop.f32.mrb[53].mxu0 }
 0x3e6   : > { %3439 = vst [vmem:[%s5380_s27 + $0x40] sm:$0xff] %v3407_v45  ;;  %v3408_v42 = vmax.f32 %v3376_v8, 0.0  ;;  %v3308_v10 = vmul.f32 %v5360_v22, %v3210_v52  ;;  %v3907_v49 = vpop.f32.mrb[54].mxu0 }
 0x3e7   : > { %3442 = vst [vmem:[%s5380_s27 + $0x58] sm:$0xff] %v3410_v47  ;;  %v3349_v43 = vadd.f32 %v5365_v63, %v3310_v17  ;;  %v3311_v44 = vmul.f32 %v3907_v49, %v5360_v22  ;;  %v3213_v51 = vpop.f32.mrb[55].mxu0  ;;  %v4039_v47 = vld [vmem:[%s4142_s24 + $0xa0] sm:$0xff] }
 0x3e8   : > { %3440 = vst [vmem:[%s5380_s27 + $0x48] sm:$0xff] %v3408_v42  ;;  %v3347_v30 = vadd.f32 %v5365_v63, %v3308_v10  ;;  %v3309_v5 = vmul.f32 %v5360_v22, %v3213_v51  ;;  %v4040_v10 = vld [vmem:[%s4142_s24 + $0xb8] sm:$0xff] }
 0x3e9   : > { %v3381_v7 = vadd.f32 %v4030_v32, %v3349_v43  ;;  %v3350_v4 = vadd.f32 %v5365_v63, %v3311_v44  ;;  %v4041_v44 = vld [vmem:[%s4142_s24 + $0xa8] sm:$0xff] }
 0x3ea   : > { %v3379_v56 = vadd.f32 %v4031_v6, %v3347_v30  ;;  %v3348_v55 = vadd.f32 %v5365_v63, %v3309_v5 }
 0x3eb   : > { %v3413_v53 = vmax.f32 %v3381_v7, 0.0  ;;  %v3382_v38 = vadd.f32 %v4032_v1, %v3350_v4 }
 0x3ec   : > { %v3411_v36 = vmax.f32 %v3379_v56, 0.0  ;;  %v3380_v16 = vadd.f32 %v4033_v23, %v3348_v55  ;;  %v3910_v24 = vpop.f32.mrb[56].mxu0  ;;  %v4042_v23 = vld [vmem:[%s4142_s24 + $0xd0] sm:$0xff] }
 0x3ed   : > { %3445 = vst [vmem:[%s5380_s27 + $0x70] sm:$0xff] %v3413_v53  ;;  %v3414_v46 = vmax.f32 %v3382_v38, 0.0  ;;  %v3314_v15 = vmul.f32 %v3910_v24, %v5360_v22  ;;  %v3226_v9 = vpop.f32.mrb[57].mxu0 }
 0x3ee   : > { %3443 = vst [vmem:[%s5380_s27 + $0x60] sm:$0xff] %v3411_v36  ;;  %v3412_v11 = vmax.f32 %v3380_v16, 0.0  ;;  %v3312_v50 = vmul.f32 %v5360_v22, %v3226_v9  ;;  %v3911_v0 = vpop.f32.mrb[58].mxu0 }
 0x3ef   : > { %3446 = vst [vmem:[%s5380_s27 + $0x78] sm:$0xff] %v3414_v46  ;;  %v3353_v25 = vadd.f32 %v5365_v63, %v3314_v15  ;;  %v3315_v40 = vmul.f32 %v3911_v0, %v5360_v22  ;;  %v3229_v28 = vpop.f32.mrb[59].mxu0  ;;  %v4043_v46 = vld [vmem:[%s4142_s24 + $0xc0] sm:$0xff] }
 0x3f0   : > { %3444 = vst [vmem:[%s5380_s27 + $0x68] sm:$0xff] %v3412_v11  ;;  %v3351_v20 = vadd.f32 %v5365_v63, %v3312_v50  ;;  %v3313_v62 = vmul.f32 %v5360_v22, %v3229_v28  ;;  %v4044_v50 = vld [vmem:[%s4142_s24 + $0xd8] sm:$0xff] }
 0x3f1   : > { %v3385_v34 = vadd.f32 %v4034_v37, %v3353_v25  ;;  %v3354_v12 = vadd.f32 %v5365_v63, %v3315_v40  ;;  %v4045_v40 = vld [vmem:[%s4142_s24 + $0xc8] sm:$0xff] }
 0x3f2   : > { %v3383_v31 = vadd.f32 %v4035_v29, %v3351_v20  ;;  %v3352_v58 = vadd.f32 %v5365_v63, %v3313_v62 }
 0x3f3   : > { %v3417_v18 = vmax.f32 %v3385_v34, 0.0  ;;  %v3386_v59 = vadd.f32 %v4036_v21, %v3354_v12 }
 0x3f4   : > { %v3415_v19 = vmax.f32 %v3383_v31, 0.0  ;;  %v3384_v54 = vadd.f32 %v4037_v13, %v3352_v58  ;;  %v3914_v61 = vpop.f32.mrb[60].mxu0  ;;  %v4046_v13 = vld [vmem:[%s4142_s24 + $0xf0] sm:$0xff] }
 0x3f5   : > { %3449 = vst [vmem:[%s5380_s27 + $0x90] sm:$0xff] %v3417_v18  ;;  %v3418_v48 = vmax.f32 %v3386_v59, 0.0  ;;  %v3318_v27 = vmul.f32 %v3914_v61, %v5360_v22  ;;  %v3242_v35 = vpop.f32.mrb[61].mxu0 }
 0x3f6   : > { %3447 = vst [vmem:[%s5380_s27 + $0x80] sm:$0xff] %v3415_v19  ;;  %v3416_v33 = vmax.f32 %v3384_v54, 0.0  ;;  %v3316_v14 = vmul.f32 %v5360_v22, %v3242_v35  ;;  %v3915_v60 = vpop.f32.mrb[62].mxu0 }
 0x3f7   : > { %3450 = vst [vmem:[%s5380_s27 + $0x98] sm:$0xff] %v3418_v48  ;;  %v3357_v26 = vadd.f32 %v5365_v63, %v3318_v27  ;;  %v3319_v41 = vmul.f32 %v3915_v60, %v5360_v22  ;;  %v3245_v3 = vpop.f32.mrb[63].mxu0  ;;  %v4047_v48 = vld [vmem:[%s4142_s24 + $0xe0] sm:$0xff] }
 0x3f8   : > { %3448 = vst [vmem:[%s5380_s27 + $0x88] sm:$0xff] %v3416_v33  ;;  %v3355_v39 = vadd.f32 %v5365_v63, %v3316_v14  ;;  %v3317_v45 = vmul.f32 %v5360_v22, %v3245_v3  ;;  %v4048_v14 = vld [vmem:[%s4142_s24 + $0xf8] sm:$0xff] }
 0x3f9   : > { %v3389_v8 = vadd.f32 %v4038_v2, %v3357_v26  ;;  %v3358_v57 = vadd.f32 %v5365_v63, %v3319_v41  ;;  %v4049_v41 = vld [vmem:[%s4142_s24 + $0xe8] sm:$0xff] }
 0x3fa   : > { %v3387_v17 = vadd.f32 %v4039_v47, %v3355_v39  ;;  %v3356_v52 = vadd.f32 %v5365_v63, %v3317_v45 }
 0x3fb   : > { %v3421_v42 = vmax.f32 %v3389_v8, 0.0  ;;  %v3390_v49 = vadd.f32 %v4040_v10, %v3358_v57 }
 0x3fc   : > { %v3419_v43 = vmax.f32 %v3387_v17, 0.0  ;;  %v3388_v51 = vadd.f32 %v4041_v44, %v3356_v52  ;;  %v3918_v30 = vpop.f32.mrb[64].mxu0 }
 0x3fd   : > { %3453 = vst [vmem:[%s5380_s27 + $0xb0] sm:$0xff] %v3421_v42  ;;  %v3422_v5 = vmax.f32 %v3390_v49, 0.0  ;;  %v3322_v32 = vmul.f32 %v3918_v30, %v5360_v22  ;;  %v3258_v7 = vpop.f32.mrb[65].mxu0 }
 0x3fe   : > { %3451 = vst [vmem:[%s5380_s27 + $0xa0] sm:$0xff] %v3419_v43  ;;  %v3420_v4 = vmax.f32 %v3388_v51, 0.0  ;;  %v3320_v6 = vmul.f32 %v5360_v22, %v3258_v7  ;;  %v3919_v56 = vpop.f32.mrb[66].mxu0 }
 0x3ff   : > { %3454 = vst [vmem:[%s5380_s27 + $0xb8] sm:$0xff] %v3422_v5  ;;  %v3361_v55 = vadd.f32 %v5365_v63, %v3322_v32  ;;  %v3323_v53 = vmul.f32 %v3919_v56, %v5360_v22  ;;  %v3261_v1 = vpop.f32.mrb[67].mxu0 }
 0x400   : > { %3452 = vst [vmem:[%s5380_s27 + $0xa8] sm:$0xff] %v3420_v4  ;;  %v3359_v38 = vadd.f32 %v5365_v63, %v3320_v6  ;;  %v3321_v36 = vmul.f32 %v5360_v22, %v3261_v1 }
 0x401   : > { %v3393_v16 = vadd.f32 %v4042_v23, %v3361_v55  ;;  %v3362_v24 = vadd.f32 %v5365_v63, %v3323_v53 }
 0x402   : > { %v3391_v15 = vadd.f32 %v4043_v46, %v3359_v38  ;;  %v3360_v9 = vadd.f32 %v5365_v63, %v3321_v36 }
 0x403   : > { %v3425_v11 = vmax.f32 %v3393_v16, 0.0  ;;  %v3394_v0 = vadd.f32 %v4044_v50, %v3362_v24 }
 0x404   : > { %v3423_v25 = vmax.f32 %v3391_v15, 0.0  ;;  %v3392_v28 = vadd.f32 %v4045_v40, %v3360_v9  ;;  %v3922_v20 = vpop.f32.mrb[68].mxu0 }
 0x405   : > { %3457 = vst [vmem:[%s5380_s27 + $0xd0] sm:$0xff] %v3425_v11  ;;  %v3426_v62 = vmax.f32 %v3394_v0, 0.0  ;;  %v3326_v37 = vmul.f32 %v3922_v20, %v5360_v22  ;;  %v3274_v34 = vpop.f32.mrb[69].mxu0 }
 0x406   : > { %3455 = vst [vmem:[%s5380_s27 + $0xc0] sm:$0xff] %v3423_v25  ;;  %v3424_v12 = vmax.f32 %v3392_v28, 0.0  ;;  %v3324_v29 = vmul.f32 %v5360_v22, %v3274_v34  ;;  %v3923_v31 = vpop.f32.mrb[70].mxu0 }
 0x407   : > { %3458 = vst [vmem:[%s5380_s27 + $0xd8] sm:$0xff] %v3426_v62  ;;  %v3365_v58 = vadd.f32 %v5365_v63, %v3326_v37  ;;  %v3327_v18 = vmul.f32 %v3923_v31, %v5360_v22  ;;  %v3277_v21 = vpop.f32.mrb[71].mxu0 }
 0x408   : > { %3456 = vst [vmem:[%s5380_s27 + $0xc8] sm:$0xff] %v3424_v12  ;;  %v3363_v59 = vadd.f32 %v5365_v63, %v3324_v29  ;;  %v3325_v19 = vmul.f32 %v5360_v22, %v3277_v21 }
 0x409   : > { %v3397_v54 = vadd.f32 %v4046_v13, %v3365_v58  ;;  %v3366_v61 = vadd.f32 %v5365_v63, %v3327_v18 }
 0x40a   : > { %v3395_v27 = vadd.f32 %v4047_v48, %v3363_v59  ;;  %v3364_v35 = vadd.f32 %v5365_v63, %v3325_v19 }
 0x40b   : > { %v3429_v33 = vmax.f32 %v3397_v54, 0.0  ;;  %v3398_v60 = vadd.f32 %v4048_v14, %v3366_v61 }
 0x40c   : > { %v3427_v26 = vmax.f32 %v3395_v27, 0.0  ;;  %v3396_v3 = vadd.f32 %v4049_v41, %v3364_v35 }
 0x40d   : > { %3461 = vst [vmem:[%s5380_s27 + $0xf0] sm:$0xff] %v3429_v33  ;;  %v3430_v39 = vmax.f32 %v3398_v60, 0.0 }
 0x40e   : > { %3459 = vst [vmem:[%s5380_s27 + $0xe0] sm:$0xff] %v3427_v26  ;;  %v3428_v22 = vmax.f32 %v3396_v3, 0.0 }
 0x40f   : > { %3462 = vst [vmem:[%s5380_s27 + $0xf8] sm:$0xff] %v3430_v39 }
 0x410   : > { %3460 = vst [vmem:[%s5380_s27 + $0xe8] sm:$0xff] %v3428_v22 }
 0x411 PF: > { %s20_s13 = sadd.s32 1, %s4056_s13  }
 0x412   : > { %p17_p4 = scmp.ge.s32.totalorder %s20_s13, 4  }
 0x414   :  { %19 = sbr.rel (!%p17_p4) target bundleno = 1 (0x1), region = 92 }

</bundles_post_ra>
